<compile_context>
chip_gen: v7x
topology: tpu7x:2x2x1
jax: 0.10.0
libtpu: 0.0.40
codegen_flags: <defaults>
</compile_context>

<pallas_src>
import functools

import numpy as np
import jax
import jax.numpy as jnp
from jax import lax
from jax.experimental import pallas as pl
from jax.experimental.pallas import tpu as pltpu


# ---------------------------------------------------------------------------
# pltpu.roll sign probe (one tiny kernel, cached).  The depthwise conv relies
# on roll(x, s, axis) == jnp.roll(x, s, axis); this makes the tap shifts
# robust to either sign convention, and falls back to the interpreter (or a
# safe default) when no TPU is available.
# ---------------------------------------------------------------------------
@functools.cache
def _roll_matches_jnp() -> bool:
    def k(x_ref, o_ref):
        o_ref[...] = pltpu.roll(x_ref[...], 5, 1)

    x = jnp.arange(8 * 128, dtype=jnp.float32).reshape(8, 128)
    call = pl.pallas_call(k, out_shape=jax.ShapeDtypeStruct((8, 128), jnp.float32))
    try:
        y = jax.block_until_ready(call(x))
    except Exception:
        try:
            with pltpu.force_tpu_interpret_mode():
                y = call(x)
        except Exception:
            return True  # assume jnp.roll convention
    return bool(jnp.array_equal(y, jnp.roll(x, 5, axis=1)))


# ---------------------------------------------------------------------------
# Depthwise 3x3x3 taps as flat-index offsets + (27, S) zero-padding masks.
# Lane-dense layout: each mask row is a full (S,) vector, no sublane padding.
# ---------------------------------------------------------------------------
def _tap_offsets_and_masks(D, H, W):
    S = D * H * W
    d = np.arange(D)[:, None, None]
    h = np.arange(H)[None, :, None]
    w = np.arange(W)[None, None, :]
    offsets, masks = [], []
    for dd in (-1, 0, 1):
        for dh in (-1, 0, 1):
            for dw in (-1, 0, 1):
                offsets.append((dd * H + dh) * W + dw)
                m = ((d + dd >= 0) & (d + dd < D) &
                     (h + dh >= 0) & (h + dh < H) &
                     (w + dw >= 0) & (w + dw < W))
                masks.append(m.reshape(S))
    masks = np.stack(masks).astype(np.float32)          # (27, S)
    return offsets, masks


# ---------------------------------------------------------------------------
# Exact GELU (erf via Abramowitz & Stegun 7.1.26, |err| <= 1.5e-7).
# Self-contained so it lowers regardless of whether lax.erf has a Mosaic rule.
# ---------------------------------------------------------------------------
_SQRT_HALF = float(1.0 / np.sqrt(2.0))


def _erf(x):
    p = 0.3275911
    a1, a2, a3, a4, a5 = (0.254829592, -0.284496736, 1.421413741,
                          -1.453152027, 1.061405429)
    ax = jnp.abs(x)
    t = 1.0 / (1.0 + p * ax)
    poly = ((((a5 * t + a4) * t + a3) * t + a2) * t + a1) * t
    y = 1.0 - poly * jnp.exp(-(ax * ax))
    return jnp.where(x < 0.0, -y, y)


def _gelu_exact(x):
    return 0.5 * x * (1.0 + _erf(x * _SQRT_HALF))


# ---------------------------------------------------------------------------
# Fused kernel factory: one batch element per grid step, (C, S) layout.
# ---------------------------------------------------------------------------
def _make_kernel(offsets, S, hidden, roll_is_jnp, has_flow):
    center = offsets.index(0)   # the (0,0,0) tap; its mask is all ones

    def _trunk(x_ref, m_ref, wi_ref, bi_ref, wd_ref, bd_ref):
        x = x_ref[0]                                             # (Cin, S) f32

        # project_in: 1x1x1 conv == channel matmul; bf16 MXU + f32 accumulate.
        y = jnp.dot(wi_ref[...], x.astype(jnp.bfloat16),
                    preferred_element_type=jnp.float32) + bi_ref[...]  # (C2,S)

        # depthwise 3x3x3 (stride 1, zero pad 1): each tap is a lane roll of
        # the flattened volume, masked at the volume boundary.  f32 on VPU.
        # Center tap seeds the accumulator (no zero-fill, no mask multiply).
        acc = y * wd_ref[:, pl.ds(center, 1)]                    # (C2,S)*(C2,1)
        for t, off in enumerate(offsets):
            if off == 0:
                continue
            shift = (-off) % S if roll_is_jnp else off % S
            src = pltpu.roll(y, shift, 1)                        # XLU, free slot
            acc = acc + (src * m_ref[pl.ds(t, 1), :]) * wd_ref[:, pl.ds(t, 1)]
        acc = acc + bd_ref[...]

        # GELU gate: split on the leading channel axis (8-aligned, free).
        x1 = acc[:hidden]
        x2 = acc[hidden:]
        g = _gelu_exact(x1) * x2                                 # (hidden, S) f32
        return g.astype(jnp.bfloat16)

    if has_flow:
        def kernel(x_ref, m_ref, wi_ref, bi_ref, wd_ref, bd_ref,
                   woa_ref, boa_ref, wob_ref, bob_ref, o_ref, f_ref):
            g = _trunk(x_ref, m_ref, wi_ref, bi_ref, wd_ref, bd_ref)
            o_ref[0] = (jnp.dot(woa_ref[...], g, preferred_element_type=jnp.float32)
                        + boa_ref[...]).astype(o_ref.dtype)
            f_ref[0] = (jnp.dot(wob_ref[...], g, preferred_element_type=jnp.float32)
                        + bob_ref[...]).astype(f_ref.dtype)
        return kernel

    def kernel(x_ref, m_ref, wi_ref, bi_ref, wd_ref, bd_ref,
               woa_ref, boa_ref, o_ref):
        g = _trunk(x_ref, m_ref, wi_ref, bi_ref, wd_ref, bd_ref)
        o_ref[0] = (jnp.dot(woa_ref[...], g, preferred_element_type=jnp.float32)
                    + boa_ref[...]).astype(o_ref.dtype)
    return kernel


def feedforward_forward(x_ncdhw, params, dim, flow_dim):
    """Fused FeedForward forward pass on NCDHW input (PyTorch layout)."""
    w_in, b_in, w_dw, b_dw, w_out, b_out = params
    N, C, D, H, W = x_ncdhw.shape
    assert C == dim
    S = D * H * W
    c2 = w_in.shape[0]
    hidden = c2 // 2
    cout = w_out.shape[0]
    assert cout == dim + flow_dim

    offsets, masks_np = _tap_offsets_and_masks(D, H, W)
    masks = jnp.asarray(masks_np)                       # (27, S) f32

    # NCDHW -> (N, C, S): pure reshape, no transpose / extra HBM pass.
    x2 = x_ncdhw.reshape(N, C, S)

    # Pre-cast MXU weights to bf16 once (f32 accumulation stays in-kernel).
    w_in_bf = w_in.astype(jnp.bfloat16)
    wo_a = w_out[:dim].astype(jnp.bfloat16)
    bo_a = b_out[:dim]
    has_flow = flow_dim > 0
    if has_flow:
        wo_b = w_out[dim:].astype(jnp.bfloat16)
        bo_b = b_out[dim:]

    kernel = _make_kernel(offsets, S, hidden, _roll_matches_jnp(), has_flow)

    dtype = x_ncdhw.dtype
    flops = (2 * N * S * (C * c2 + hidden * cout)       # two matmuls
             + N * S * c2 * (3 * 26 + 2)                # depthwise taps
             + 25 * N * S * hidden)                     # gelu gate
    bytes_accessed = (4 * (x2.size + N * cout * S)
                      + int(masks.size) * 4
                      + 2 * w_in.size + 2 * w_out.size
                      + 4 * (b_in.size + w_dw.size + b_dw.size + b_out.size))

    common = dict(
        grid=(N,),
        compiler_params=pltpu.CompilerParams(
            dimension_semantics=("parallel",),
            vmem_limit_bytes=32 * 1024 * 1024,
        ),
        cost_estimate=pl.CostEstimate(
            flops=int(flops),
            transcendentals=int(N * S * hidden),        # one exp per gelu elem
            bytes_accessed=int(bytes_accessed),
        ),
    )
    base_in_specs = [
        pl.BlockSpec((1, C, S), lambda n: (n, 0, 0)),   # x (one batch element)
        pl.BlockSpec((27, S), lambda n: (0, 0)),        # boundary masks
        pl.BlockSpec((c2, C), lambda n: (0, 0)),        # W_in (bf16)
        pl.BlockSpec((c2, 1), lambda n: (0, 0)),        # b_in
        pl.BlockSpec((c2, 27), lambda n: (0, 0)),       # depthwise taps (lanes=27)
        pl.BlockSpec((c2, 1), lambda n: (0, 0)),        # b_dw
    ]

    if has_flow:
        out, flow = pl.pallas_call(
            kernel,
            out_shape=(jax.ShapeDtypeStruct((N, dim, S), dtype),
                       jax.ShapeDtypeStruct((N, flow_dim, S), dtype)),
            in_specs=base_in_specs + [
                pl.BlockSpec((dim, hidden), lambda n: (0, 0)),       # W_out[:dim]
                pl.BlockSpec((dim, 1), lambda n: (0, 0)),            # b_out[:dim]
                pl.BlockSpec((flow_dim, hidden), lambda n: (0, 0)),  # W_out[dim:]
                pl.BlockSpec((flow_dim, 1), lambda n: (0, 0)),       # b_out[dim:]
            ],
            out_specs=(pl.BlockSpec((1, dim, S), lambda n: (n, 0, 0)),
                       pl.BlockSpec((1, flow_dim, S), lambda n: (n, 0, 0))),
            **common,
        )(x2, masks, w_in_bf, b_in, w_dw, b_dw, wo_a, bo_a, wo_b, bo_b)
        return out.reshape(N, dim, D, H, W), flow.reshape(N, flow_dim, D, H, W)

    out = pl.pallas_call(
        kernel,
        out_shape=jax.ShapeDtypeStruct((N, dim, S), dtype),
        in_specs=base_in_specs + [
            pl.BlockSpec((dim, hidden), lambda n: (0, 0)),
            pl.BlockSpec((dim, 1), lambda n: (0, 0)),
        ],
        out_specs=pl.BlockSpec((1, dim, S), lambda n: (n, 0, 0)),
        **common,
    )(x2, masks, w_in_bf, b_in, w_dw, b_dw, wo_a, bo_a)
    return out.reshape(N, dim, D, H, W)


# ---------------------------------------------------------------------------
# Parameters (kernel-friendly, unpadded layouts).
# ---------------------------------------------------------------------------
def init_params(key, dim, ffn_expansion_factor, flow_dim_ratio):
    hidden = int(dim * ffn_expansion_factor)
    flow_dim = int(dim * flow_dim_ratio)
    c2 = 2 * hidden
    cout = dim + flow_dim
    ks = jax.random.split(key, 6)
    s = 0.1
    w_in = s * jax.random.normal(ks[0], (c2, dim), jnp.float32)     # (C2, Cin)
    b_in = s * jax.random.normal(ks[1], (c2, 1), jnp.float32)
    w_dw = s * jax.random.normal(ks[2], (c2, 27), jnp.float32)      # channel-major taps
    b_dw = s * jax.random.normal(ks[3], (c2, 1), jnp.float32)
    w_out = s * jax.random.normal(ks[4], (cout, hidden), jnp.float32)
    b_out = s * jax.random.normal(ks[5], (cout, 1), jnp.float32)
    return (w_in, b_in, w_dw, b_dw, w_out, b_out), hidden, flow_dim


# ---------------------------------------------------------------------------
# Pure-JAX (f32, HIGHEST) reference mirroring the PyTorch module.
# ---------------------------------------------------------------------------
def reference_forward(x, params, dim, flow_dim):
    w_in, b_in, w_dw, b_dw, w_out, b_out = params

    def pw(v, w, b):  # 1x1x1 conv, w: (Cout, Cin)
        rhs = w[:, :, None, None, None]
        y = lax.conv_general_dilated(
            v, rhs, (1, 1, 1), "VALID",
            dimension_numbers=("NCDHW", "OIDHW", "NCDHW"),
            precision=lax.Precision.HIGHEST)
        return y + b.reshape(1, -1, 1, 1, 1)

    y = pw(x, w_in, b_in)
    c2 = y.shape[1]
    rhs_dw = w_dw.reshape(c2, 3, 3, 3)[:, None]          # (C2, 1, 3, 3, 3)
    yd = lax.conv_general_dilated(
        y, rhs_dw, (1, 1, 1), ((1, 1), (1, 1), (1, 1)),
        dimension_numbers=("NCDHW", "OIDHW", "NCDHW"),
        feature_group_count=c2, precision=lax.Precision.HIGHEST)
    yd = yd + b_dw.reshape(1, -1, 1, 1, 1)
    x1, x2 = jnp.split(yd, 2, axis=1)
    g = jax.nn.gelu(x1, approximate=False) * x2
    o = pw(g, w_out, b_out)
    if flow_dim == 0:
        return o
    return o[:, :dim], o[:, dim:]


if __name__ == "__main__":
    dim, ffn_expansion_factor, flow_dim_ratio = 4, 2.0, 0.5
    N, D, H, W = 2, 4, 8, 8

    key = jax.random.PRNGKey(0)
    kx, kp = jax.random.split(key)
    params, hidden, flow_dim = init_params(kp, dim, ffn_expansion_factor, flow_dim_ratio)
    x = jax.random.normal(kx, (N, dim, D, H, W), jnp.float32)   # NCDHW, like torch

    out, flow = feedforward_forward(x, params, dim, flow_dim)
    out = jax.block_until_ready(out)
    flow = jax.block_until_ready(flow)

    ref_out, ref_flow = reference_forward(x, params, dim, flow_dim)
    assert out.shape == (N, dim, D, H, W)
    assert flow.shape == (N, flow_dim, D, H, W)
    # bf16 MXU inputs (f32 accumulate) vs the all-f32 HIGHEST reference.
    assert jnp.allclose(out, ref_out, atol=1e-2, rtol=1e-2), \
        float(jnp.max(jnp.abs(out - ref_out)))
    assert jnp.allclose(flow, ref_flow, atol=1e-2, rtol=1e-2), \
        float(jnp.max(jnp.abs(flow - ref_flow)))
    print("KERNEL_OK")
</pallas_src>

<mosaic_0001>
module attributes {stable_mosaic.version = 11 : i64} {
  func.func @k(%arg0: memref<8x128xf32, #tpu.memory_space<vmem>>, %arg1: memref<8x128xf32, #tpu.memory_space<vmem>>) attributes {dimension_semantics = [], scalar_prefetch = 0 : i64, scratch_operands = 0 : i64, tpu.core_type = #tpu.core_type<tc>} {
    %c0 = arith.constant 0 : index
    %c0_0 = arith.constant 0 : index
    %0 = vector.load %arg0[%c0, %c0_0] : memref<8x128xf32, #tpu.memory_space<vmem>>, vector<8x128xf32>
    %c5_i32 = arith.constant 5 : i32
    %1 = tpu.dynamic_rotate %0 by %c5_i32 dim 1 : vector<8x128xf32>, i32 -> vector<8x128xf32>
    %c0_1 = arith.constant 0 : index
    %c0_2 = arith.constant 0 : index
    %2 = vector.load %arg1[%c0_1, %c0_2] : memref<8x128xf32, #tpu.memory_space<vmem>>, vector<8x128xf32>
    tpu.vector_store %arg1[%c0_1, %c0_2], %1 {strides = array<i32>} : memref<8x128xf32, #tpu.memory_space<vmem>>, vector<8x128xf32>,
    return
  }
}

module attributes {stable_mosaic.version = 11 : i64} {
  func.func @k(%arg0: memref<8x128xf32, #tpu.memory_space<vmem>>, %arg1: memref<8x128xf32, #tpu.memory_space<vmem>>) attributes {dimension_semantics = [], scalar_prefetch = 0 : i64, scratch_operands = 0 : i64, tpu.core_type = #tpu.core_type<tc>} {
    %c0 = arith.constant 0 : index
    %c0_0 = arith.constant 0 : index
    %0 = vector.load %arg0[%c0, %c0_0] : memref<8x128xf32, #tpu.memory_space<vmem>>, vector<8x128xf32>
    %c5_i32 = arith.constant 5 : i32
    %1 = tpu.dynamic_rotate %0 by %c5_i32 dim 1 : vector<8x128xf32>, i32 -> vector<8x128xf32>
    %c0_1 = arith.constant 0 : index
    %c0_2 = arith.constant 0 : index
    %2 = vector.load %arg1[%c0_1, %c0_2] : memref<8x128xf32, #tpu.memory_space<vmem>>, vector<8x128xf32>
    tpu.vector_store %arg1[%c0_1, %c0_2], %1 {strides = array<i32>} : memref<8x128xf32, #tpu.memory_space<vmem>>, vector<8x128xf32>,
    return
  }
}

module attributes {stable_mosaic.version = 11 : i64} {
  func.func @kernel(%arg0: i32, %arg1: memref<1x4x256xf32, #tpu.memory_space<vmem>>, %arg2: memref<27x256xf32, #tpu.memory_space<vmem>>, %arg3: memref<16x4xbf16, #tpu.memory_space<vmem>>, %arg4: memref<16x1xf32, #tpu.memory_space<vmem>>, %arg5: memref<16x27xf32, #tpu.memory_space<vmem>>, %arg6: memref<16x1xf32, #tpu.memory_space<vmem>>, %arg7: memref<4x8xbf16, #tpu.memory_space<vmem>>, %arg8: memref<4x1xf32, #tpu.memory_space<vmem>>, %arg9: memref<2x8xbf16, #tpu.memory_space<vmem>>, %arg10: memref<2x1xf32, #tpu.memory_space<vmem>>, %arg11: memref<1x4x256xf32, #tpu.memory_space<vmem>>, %arg12: memref<1x2x256xf32, #tpu.memory_space<vmem>>) attributes {dimension_semantics = [#tpu.dimension_semantics<parallel>], iteration_bounds = array<i64: 2>, scalar_prefetch = 0 : i64, scratch_operands = 0 : i64, tpu.core_type = #tpu.core_type<tc>, window_params = [{transform_indices = @transform_0, window_bounds = array<i64: 1, 4, 256>}, {pipeline_mode = #tpu.pipeline_mode<synchronous>, transform_indices = @transform_1, window_bounds = array<i64: 27, 256>}, {pipeline_mode = #tpu.pipeline_mode<synchronous>, transform_indices = @transform_2, window_bounds = array<i64: 16, 4>}, {pipeline_mode = #tpu.pipeline_mode<synchronous>, transform_indices = @transform_3, window_bounds = array<i64: 16, 1>}, {pipeline_mode = #tpu.pipeline_mode<synchronous>, transform_indices = @transform_4, window_bounds = array<i64: 16, 27>}, {pipeline_mode = #tpu.pipeline_mode<synchronous>, transform_indices = @transform_5, window_bounds = array<i64: 16, 1>}, {pipeline_mode = #tpu.pipeline_mode<synchronous>, transform_indices = @transform_6, window_bounds = array<i64: 4, 8>}, {pipeline_mode = #tpu.pipeline_mode<synchronous>, transform_indices = @transform_7, window_bounds = array<i64: 4, 1>}, {pipeline_mode = #tpu.pipeline_mode<synchronous>, transform_indices = @transform_8, window_bounds = array<i64: 2, 8>}, {pipeline_mode = #tpu.pipeline_mode<synchronous>, transform_indices = @transform_9, window_bounds = array<i64: 2, 1>}, {transform_indices = @transform_10, window_bounds = array<i64: 1, 4, 256>}, {transform_indices = @transform_11, window_bounds = array<i64: 1, 2, 256>}]} {
    %c0 = arith.constant 0 : index
    %c0_0 = arith.constant 0 : index
    %c0_1 = arith.constant 0 : index
    %0 = vector.load %arg1[%c0, %c0_0, %c0_1] : memref<1x4x256xf32, #tpu.memory_space<vmem>>, vector<1x4x256xf32>
    %1 = vector.shape_cast %0 : vector<1x4x256xf32> to vector<4x256xf32>
    %c0_2 = arith.constant 0 : index
    %c0_3 = arith.constant 0 : index
    %2 = vector.load %arg3[%c0_2, %c0_3] : memref<16x4xbf16, #tpu.memory_space<vmem>>, vector<16x4xbf16>
    %3 = arith.truncf %1 : vector<4x256xf32> to vector<4x256xbf16>
    %cst = arith.constant dense<0.000000e+00> : vector<16x256xf32>
    %4 = tpu.matmul %2, %3, %cst {dimension_numbers = #tpu.dot_dimension_numbers<[1], [0], [0], [1], [0, 0, 1, 1], [], []>} : vector<16x4xbf16>, vector<4x256xbf16>, vector<16x256xf32> -> vector<16x256xf32>
    %c0_4 = arith.constant 0 : index
    %c0_5 = arith.constant 0 : index
    %5 = vector.load %arg4[%c0_4, %c0_5] : memref<16x1xf32, #tpu.memory_space<vmem>>, vector<16x1xf32>
    %6 = vector.broadcast %5 : vector<16x1xf32> to vector<16x256xf32>
    %7 = arith.addf %4, %6 : vector<16x256xf32>
    %c0_6 = arith.constant 0 : index
    %c13 = arith.constant 13 : index
    %8 = vector.load %arg5[%c0_6, %c13] : memref<16x27xf32, #tpu.memory_space<vmem>>, vector<16x1xf32>
    %9 = vector.broadcast %8 : vector<16x1xf32> to vector<16x256xf32>
    %10 = arith.mulf %7, %9 : vector<16x256xf32>
    %c73_i32 = arith.constant 73 : i32
    %11 = tpu.dynamic_rotate %7 by %c73_i32 dim 1 : vector<16x256xf32>, i32 -> vector<16x256xf32>
    %c0_7 = arith.constant 0 : index
    %c0_8 = arith.constant 0 : index
    %12 = vector.load %arg2[%c0_7, %c0_8] : memref<27x256xf32, #tpu.memory_space<vmem>>, vector<1x256xf32>
    %13 = vector.broadcast %12 : vector<1x256xf32> to vector<16x256xf32>
    %14 = arith.mulf %11, %13 : vector<16x256xf32>
    %c0_9 = arith.constant 0 : index
    %c0_10 = arith.constant 0 : index
    %15 = vector.load %arg5[%c0_9, %c0_10] : memref<16x27xf32, #tpu.memory_space<vmem>>, vector<16x1xf32>
    %16 = vector.broadcast %15 : vector<16x1xf32> to vector<16x256xf32>
    %17 = arith.mulf %14, %16 : vector<16x256xf32>
    %18 = arith.addf %10, %17 : vector<16x256xf32>
    %c72_i32 = arith.constant 72 : i32
    %19 = tpu.dynamic_rotate %7 by %c72_i32 dim 1 : vector<16x256xf32>, i32 -> vector<16x256xf32>
    %c1 = arith.constant 1 : index
    %c0_11 = arith.constant 0 : index
    %20 = vector.load %arg2[%c1, %c0_11] : memref<27x256xf32, #tpu.memory_space<vmem>>, vector<1x256xf32>
    %21 = vector.broadcast %20 : vector<1x256xf32> to vector<16x256xf32>
    %22 = arith.mulf %19, %21 : vector<16x256xf32>
    %c0_12 = arith.constant 0 : index
    %c1_13 = arith.constant 1 : index
    %23 = vector.load %arg5[%c0_12, %c1_13] : memref<16x27xf32, #tpu.memory_space<vmem>>, vector<16x1xf32>
    %24 = vector.broadcast %23 : vector<16x1xf32> to vector<16x256xf32>
    %25 = arith.mulf %22, %24 : vector<16x256xf32>
    %26 = arith.addf %18, %25 : vector<16x256xf32>
    %c71_i32 = arith.constant 71 : i32
    %27 = tpu.dynamic_rotate %7 by %c71_i32 dim 1 : vector<16x256xf32>, i32 -> vector<16x256xf32>
    %c2 = arith.constant 2 : index
    %c0_14 = arith.constant 0 : index
    %28 = vector.load %arg2[%c2, %c0_14] : memref<27x256xf32, #tpu.memory_space<vmem>>, vector<1x256xf32>
    %29 = vector.broadcast %28 : vector<1x256xf32> to vector<16x256xf32>
    %30 = arith.mulf %27, %29 : vector<16x256xf32>
    %c0_15 = arith.constant 0 : index
    %c2_16 = arith.constant 2 : index
    %31 = vector.load %arg5[%c0_15, %c2_16] : memref<16x27xf32, #tpu.memory_space<vmem>>, vector<16x1xf32>
    %32 = vector.broadcast %31 : vector<16x1xf32> to vector<16x256xf32>
    %33 = arith.mulf %30, %32 : vector<16x256xf32>
    %34 = arith.addf %26, %33 : vector<16x256xf32>
    %c65_i32 = arith.constant 65 : i32
    %35 = tpu.dynamic_rotate %7 by %c65_i32 dim 1 : vector<16x256xf32>, i32 -> vector<16x256xf32>
    %c3 = arith.constant 3 : index
    %c0_17 = arith.constant 0 : index
    %36 = vector.load %arg2[%c3, %c0_17] : memref<27x256xf32, #tpu.memory_space<vmem>>, vector<1x256xf32>
    %37 = vector.broadcast %36 : vector<1x256xf32> to vector<16x256xf32>
    %38 = arith.mulf %35, %37 : vector<16x256xf32>
    %c0_18 = arith.constant 0 : index
    %c3_19 = arith.constant 3 : index
    %39 = vector.load %arg5[%c0_18, %c3_19] : memref<16x27xf32, #tpu.memory_space<vmem>>, vector<16x1xf32>
    %40 = vector.broadcast %39 : vector<16x1xf32> to vector<16x256xf32>
    %41 = arith.mulf %38, %40 : vector<16x256xf32>
    %42 = arith.addf %34, %41 : vector<16x256xf32>
    %c64_i32 = arith.constant 64 : i32
    %43 = tpu.dynamic_rotate %7 by %c64_i32 dim 1 : vector<16x256xf32>, i32 -> vector<16x256xf32>
    %c4 = arith.constant 4 : index
    %c0_20 = arith.constant 0 : index
    %44 = vector.load %arg2[%c4, %c0_20] : memref<27x256xf32, #tpu.memory_space<vmem>>, vector<1x256xf32>
    %45 = vector.broadcast %44 : vector<1x256xf32> to vector<16x256xf32>
    %46 = arith.mulf %43, %45 : vector<16x256xf32>
    %c0_21 = arith.constant 0 : index
    %c4_22 = arith.constant 4 : index
    %47 = vector.load %arg5[%c0_21, %c4_22] : memref<16x27xf32, #tpu.memory_space<vmem>>, vector<16x1xf32>
    %48 = vector.broadcast %47 : vector<16x1xf32> to vector<16x256xf32>
    %49 = arith.mulf %46, %48 : vector<16x256xf32>
    %50 = arith.addf %42, %49 : vector<16x256xf32>
    %c63_i32 = arith.constant 63 : i32
    %51 = tpu.dynamic_rotate %7 by %c63_i32 dim 1 : vector<16x256xf32>, i32 -> vector<16x256xf32>
    %c5 = arith.constant 5 : index
    %c0_23 = arith.constant 0 : index
    %52 = vector.load %arg2[%c5, %c0_23] : memref<27x256xf32, #tpu.memory_space<vmem>>, vector<1x256xf32>
    %53 = vector.broadcast %52 : vector<1x256xf32> to vector<16x256xf32>
    %54 = arith.mulf %51, %53 : vector<16x256xf32>
    %c0_24 = arith.constant 0 : index
    %c5_25 = arith.constant 5 : index
    %55 = vector.load %arg5[%c0_24, %c5_25] : memref<16x27xf32, #tpu.memory_space<vmem>>, vector<16x1xf32>
    %56 = vector.broadcast %55 : vector<16x1xf32> to vector<16x256xf32>
    %57 = arith.mulf %54, %56 : vector<16x256xf32>
    %58 = arith.addf %50, %57 : vector<16x256xf32>
    %c57_i32 = arith.constant 57 : i32
    %59 = tpu.dynamic_rotate %7 by %c57_i32 dim 1 : vector<16x256xf32>, i32 -> vector<16x256xf32>
    %c6 = arith.constant 6 : index
    %c0_26 = arith.constant 0 : index
    %60 = vector.load %arg2[%c6, %c0_26] : memref<27x256xf32, #tpu.memory_space<vmem>>, vector<1x256xf32>
    %61 = vector.broadcast %60 : vector<1x256xf32> to vector<16x256xf32>
    %62 = arith.mulf %59, %61 : vector<16x256xf32>
    %c0_27 = arith.constant 0 : index
    %c6_28 = arith.constant 6 : index
    %63 = vector.load %arg5[%c0_27, %c6_28] : memref<16x27xf32, #tpu.memory_space<vmem>>, vector<16x1xf32>
    %64 = vector.broadcast %63 : vector<16x1xf32> to vector<16x256xf32>
    %65 = arith.mulf %62, %64 : vector<16x256xf32>
    %66 = arith.addf %58, %65 : vector<16x256xf32>
    %c56_i32 = arith.constant 56 : i32
    %67 = tpu.dynamic_rotate %7 by %c56_i32 dim 1 : vector<16x256xf32>, i32 -> vector<16x256xf32>
    %c7 = arith.constant 7 : index
    %c0_29 = arith.constant 0 : index
    %68 = vector.load %arg2[%c7, %c0_29] : memref<27x256xf32, #tpu.memory_space<vmem>>, vector<1x256xf32>
    %69 = vector.broadcast %68 : vector<1x256xf32> to vector<16x256xf32>
    %70 = arith.mulf %67, %69 : vector<16x256xf32>
    %c0_30 = arith.constant 0 : index
    %c7_31 = arith.constant 7 : index
    %71 = vector.load %arg5[%c0_30, %c7_31] : memref<16x27xf32, #tpu.memory_space<vmem>>, vector<16x1xf32>
    %72 = vector.broadcast %71 : vector<16x1xf32> to vector<16x256xf32>
    %73 = arith.mulf %70, %72 : vector<16x256xf32>
    %74 = arith.addf %66, %73 : vector<16x256xf32>
    %c55_i32 = arith.constant 55 : i32
    %75 = tpu.dynamic_rotate %7 by %c55_i32 dim 1 : vector<16x256xf32>, i32 -> vector<16x256xf32>
    %c8 = arith.constant 8 : index
    %c0_32 = arith.constant 0 : index
    %76 = vector.load %arg2[%c8, %c0_32] : memref<27x256xf32, #tpu.memory_space<vmem>>, vector<1x256xf32>
    %77 = vector.broadcast %76 : vector<1x256xf32> to vector<16x256xf32>
    %78 = arith.mulf %75, %77 : vector<16x256xf32>
    %c0_33 = arith.constant 0 : index
    %c8_34 = arith.constant 8 : index
    %79 = vector.load %arg5[%c0_33, %c8_34] : memref<16x27xf32, #tpu.memory_space<vmem>>, vector<16x1xf32>
    %80 = vector.broadcast %79 : vector<16x1xf32> to vector<16x256xf32>
    %81 = arith.mulf %78, %80 : vector<16x256xf32>
    %82 = arith.addf %74, %81 : vector<16x256xf32>
    %c9_i32 = arith.constant 9 : i32
    %83 = tpu.dynamic_rotate %7 by %c9_i32 dim 1 : vector<16x256xf32>, i32 -> vector<16x256xf32>
    %c9 = arith.constant 9 : index
    %c0_35 = arith.constant 0 : index
    %84 = vector.load %arg2[%c9, %c0_35] : memref<27x256xf32, #tpu.memory_space<vmem>>, vector<1x256xf32>
    %85 = vector.broadcast %84 : vector<1x256xf32> to vector<16x256xf32>
    %86 = arith.mulf %83, %85 : vector<16x256xf32>
    %c0_36 = arith.constant 0 : index
    %c9_37 = arith.constant 9 : index
    %87 = vector.load %arg5[%c0_36, %c9_37] : memref<16x27xf32, #tpu.memory_space<vmem>>, vector<16x1xf32>
    %88 = vector.broadcast %87 : vector<16x1xf32> to vector<16x256xf32>
    %89 = arith.mulf %86, %88 : vector<16x256xf32>
    %90 = arith.addf %82, %89 : vector<16x256xf32>
    %c8_i32 = arith.constant 8 : i32
    %91 = tpu.dynamic_rotate %7 by %c8_i32 dim 1 : vector<16x256xf32>, i32 -> vector<16x256xf32>
    %c10 = arith.constant 10 : index
    %c0_38 = arith.constant 0 : index
    %92 = vector.load %arg2[%c10, %c0_38] : memref<27x256xf32, #tpu.memory_space<vmem>>, vector<1x256xf32>
    %93 = vector.broadcast %92 : vector<1x256xf32> to vector<16x256xf32>
    %94 = arith.mulf %91, %93 : vector<16x256xf32>
    %c0_39 = arith.constant 0 : index
    %c10_40 = arith.constant 10 : index
    %95 = vector.load %arg5[%c0_39, %c10_40] : memref<16x27xf32, #tpu.memory_space<vmem>>, vector<16x1xf32>
    %96 = vector.broadcast %95 : vector<16x1xf32> to vector<16x256xf32>
    %97 = arith.mulf %94, %96 : vector<16x256xf32>
    %98 = arith.addf %90, %97 : vector<16x256xf32>
    %c7_i32 = arith.constant 7 : i32
    %99 = tpu.dynamic_rotate %7 by %c7_i32 dim 1 : vector<16x256xf32>, i32 -> vector<16x256xf32>
    %c11 = arith.constant 11 : index
    %c0_41 = arith.constant 0 : index
    %100 = vector.load %arg2[%c11, %c0_41] : memref<27x256xf32, #tpu.memory_space<vmem>>, vector<1x256xf32>
    %101 = vector.broadcast %100 : vector<1x256xf32> to vector<16x256xf32>
    %102 = arith.mulf %99, %101 : vector<16x256xf32>
    %c0_42 = arith.constant 0 : index
    %c11_43 = arith.constant 11 : index
    %103 = vector.load %arg5[%c0_42, %c11_43] : memref<16x27xf32, #tpu.memory_space<vmem>>, vector<16x1xf32>
    %104 = vector.broadcast %103 : vector<16x1xf32> to vector<16x256xf32>
    %105 = arith.mulf %102, %104 : vector<16x256xf32>
    %106 = arith.addf %98, %105 : vector<16x256xf32>
    %c1_i32 = arith.constant 1 : i32
    %107 = tpu.dynamic_rotate %7 by %c1_i32 dim 1 : vector<16x256xf32>, i32 -> vector<16x256xf32>
    %c12 = arith.constant 12 : index
    %c0_44 = arith.constant 0 : index
    %108 = vector.load %arg2[%c12, %c0_44] : memref<27x256xf32, #tpu.memory_space<vmem>>, vector<1x256xf32>
    %109 = vector.broadcast %108 : vector<1x256xf32> to vector<16x256xf32>
    %110 = arith.mulf %107, %109 : vector<16x256xf32>
    %c0_45 = arith.constant 0 : index
    %c12_46 = arith.constant 12 : index
    %111 = vector.load %arg5[%c0_45, %c12_46] : memref<16x27xf32, #tpu.memory_space<vmem>>, vector<16x1xf32>
    %112 = vector.broadcast %111 : vector<16x1xf32> to vector<16x256xf32>
    %113 = arith.mulf %110, %112 : vector<16x256xf32>
    %114 = arith.addf %106, %113 : vector<16x256xf32>
    %c255_i32 = arith.constant 255 : i32
    %115 = tpu.dynamic_rotate %7 by %c255_i32 dim 1 : vector<16x256xf32>, i32 -> vector<16x256xf32>
    %c14 = arith.constant 14 : index
    %c0_47 = arith.constant 0 : index
    %116 = vector.load %arg2[%c14, %c0_47] : memref<27x256xf32, #tpu.memory_space<vmem>>, vector<1x256xf32>
    %117 = vector.broadcast %116 : vector<1x256xf32> to vector<16x256xf32>
    %118 = arith.mulf %115, %117 : vector<16x256xf32>
    %c0_48 = arith.constant 0 : index
    %c14_49 = arith.constant 14 : index
    %119 = vector.load %arg5[%c0_48, %c14_49] : memref<16x27xf32, #tpu.memory_space<vmem>>, vector<16x1xf32>
    %120 = vector.broadcast %119 : vector<16x1xf32> to vector<16x256xf32>
    %121 = arith.mulf %118, %120 : vector<16x256xf32>
    %122 = arith.addf %114, %121 : vector<16x256xf32>
    %c249_i32 = arith.constant 249 : i32
    %123 = tpu.dynamic_rotate %7 by %c249_i32 dim 1 : vector<16x256xf32>, i32 -> vector<16x256xf32>
    %c15 = arith.constant 15 : index
    %c0_50 = arith.constant 0 : index
    %124 = vector.load %arg2[%c15, %c0_50] : memref<27x256xf32, #tpu.memory_space<vmem>>, vector<1x256xf32>
    %125 = vector.broadcast %124 : vector<1x256xf32> to vector<16x256xf32>
    %126 = arith.mulf %123, %125 : vector<16x256xf32>
    %c0_51 = arith.constant 0 : index
    %c15_52 = arith.constant 15 : index
    %127 = vector.load %arg5[%c0_51, %c15_52] : memref<16x27xf32, #tpu.memory_space<vmem>>, vector<16x1xf32>
    %128 = vector.broadcast %127 : vector<16x1xf32> to vector<16x256xf32>
    %129 = arith.mulf %126, %128 : vector<16x256xf32>
    %130 = arith.addf %122, %129 : vector<16x256xf32>
    %c248_i32 = arith.constant 248 : i32
    %131 = tpu.dynamic_rotate %7 by %c248_i32 dim 1 : vector<16x256xf32>, i32 -> vector<16x256xf32>
    %c16 = arith.constant 16 : index
    %c0_53 = arith.constant 0 : index
    %132 = vector.load %arg2[%c16, %c0_53] : memref<27x256xf32, #tpu.memory_space<vmem>>, vector<1x256xf32>
    %133 = vector.broadcast %132 : vector<1x256xf32> to vector<16x256xf32>
    %134 = arith.mulf %131, %133 : vector<16x256xf32>
    %c0_54 = arith.constant 0 : index
    %c16_55 = arith.constant 16 : index
    %135 = vector.load %arg5[%c0_54, %c16_55] : memref<16x27xf32, #tpu.memory_space<vmem>>, vector<16x1xf32>
    %136 = vector.broadcast %135 : vector<16x1xf32> to vector<16x256xf32>
    %137 = arith.mulf %134, %136 : vector<16x256xf32>
    %138 = arith.addf %130, %137 : vector<16x256xf32>
    %c247_i32 = arith.constant 247 : i32
    %139 = tpu.dynamic_rotate %7 by %c247_i32 dim 1 : vector<16x256xf32>, i32 -> vector<16x256xf32>
    %c17 = arith.constant 17 : index
    %c0_56 = arith.constant 0 : index
    %140 = vector.load %arg2[%c17, %c0_56] : memref<27x256xf32, #tpu.memory_space<vmem>>, vector<1x256xf32>
    %141 = vector.broadcast %140 : vector<1x256xf32> to vector<16x256xf32>
    %142 = arith.mulf %139, %141 : vector<16x256xf32>
    %c0_57 = arith.constant 0 : index
    %c17_58 = arith.constant 17 : index
    %143 = vector.load %arg5[%c0_57, %c17_58] : memref<16x27xf32, #tpu.memory_space<vmem>>, vector<16x1xf32>
    %144 = vector.broadcast %143 : vector<16x1xf32> to vector<16x256xf32>
    %145 = arith.mulf %142, %144 : vector<16x256xf32>
    %146 = arith.addf %138, %145 : vector<16x256xf32>
    %c201_i32 = arith.constant 201 : i32
    %147 = tpu.dynamic_rotate %7 by %c201_i32 dim 1 : vector<16x256xf32>, i32 -> vector<16x256xf32>
    %c18 = arith.constant 18 : index
    %c0_59 = arith.constant 0 : index
    %148 = vector.load %arg2[%c18, %c0_59] : memref<27x256xf32, #tpu.memory_space<vmem>>, vector<1x256xf32>
    %149 = vector.broadcast %148 : vector<1x256xf32> to vector<16x256xf32>
    %150 = arith.mulf %147, %149 : vector<16x256xf32>
    %c0_60 = arith.constant 0 : index
    %c18_61 = arith.constant 18 : index
    %151 = vector.load %arg5[%c0_60, %c18_61] : memref<16x27xf32, #tpu.memory_space<vmem>>, vector<16x1xf32>
    %152 = vector.broadcast %151 : vector<16x1xf32> to vector<16x256xf32>
    %153 = arith.mulf %150, %152 : vector<16x256xf32>
    %154 = arith.addf %146, %153 : vector<16x256xf32>
    %c200_i32 = arith.constant 200 : i32
    %155 = tpu.dynamic_rotate %7 by %c200_i32 dim 1 : vector<16x256xf32>, i32 -> vector<16x256xf32>
    %c19 = arith.constant 19 : index
    %c0_62 = arith.constant 0 : index
    %156 = vector.load %arg2[%c19, %c0_62] : memref<27x256xf32, #tpu.memory_space<vmem>>, vector<1x256xf32>
    %157 = vector.broadcast %156 : vector<1x256xf32> to vector<16x256xf32>
    %158 = arith.mulf %155, %157 : vector<16x256xf32>
    %c0_63 = arith.constant 0 : index
    %c19_64 = arith.constant 19 : index
    %159 = vector.load %arg5[%c0_63, %c19_64] : memref<16x27xf32, #tpu.memory_space<vmem>>, vector<16x1xf32>
    %160 = vector.broadcast %159 : vector<16x1xf32> to vector<16x256xf32>
    %161 = arith.mulf %158, %160 : vector<16x256xf32>
    %162 = arith.addf %154, %161 : vector<16x256xf32>
    %c199_i32 = arith.constant 199 : i32
    %163 = tpu.dynamic_rotate %7 by %c199_i32 dim 1 : vector<16x256xf32>, i32 -> vector<16x256xf32>
    %c20 = arith.constant 20 : index
    %c0_65 = arith.constant 0 : index
    %164 = vector.load %arg2[%c20, %c0_65] : memref<27x256xf32, #tpu.memory_space<vmem>>, vector<1x256xf32>
    %165 = vector.broadcast %164 : vector<1x256xf32> to vector<16x256xf32>
    %166 = arith.mulf %163, %165 : vector<16x256xf32>
    %c0_66 = arith.constant 0 : index
    %c20_67 = arith.constant 20 : index
    %167 = vector.load %arg5[%c0_66, %c20_67] : memref<16x27xf32, #tpu.memory_space<vmem>>, vector<16x1xf32>
    %168 = vector.broadcast %167 : vector<16x1xf32> to vector<16x256xf32>
    %169 = arith.mulf %166, %168 : vector<16x256xf32>
    %170 = arith.addf %162, %169 : vector<16x256xf32>
    %c193_i32 = arith.constant 193 : i32
    %171 = tpu.dynamic_rotate %7 by %c193_i32 dim 1 : vector<16x256xf32>, i32 -> vector<16x256xf32>
    %c21 = arith.constant 21 : index
    %c0_68 = arith.constant 0 : index
    %172 = vector.load %arg2[%c21, %c0_68] : memref<27x256xf32, #tpu.memory_space<vmem>>, vector<1x256xf32>
    %173 = vector.broadcast %172 : vector<1x256xf32> to vector<16x256xf32>
    %174 = arith.mulf %171, %173 : vector<16x256xf32>
    %c0_69 = arith.constant 0 : index
    %c21_70 = arith.constant 21 : index
    %175 = vector.load %arg5[%c0_69, %c21_70] : memref<16x27xf32, #tpu.memory_space<vmem>>, vector<16x1xf32>
    %176 = vector.broadcast %175 : vector<16x1xf32> to vector<16x256xf32>
    %177 = arith.mulf %174, %176 : vector<16x256xf32>
    %178 = arith.addf %170, %177 : vector<16x256xf32>
    %c192_i32 = arith.constant 192 : i32
    %179 = tpu.dynamic_rotate %7 by %c192_i32 dim 1 : vector<16x256xf32>, i32 -> vector<16x256xf32>
    %c22 = arith.constant 22 : index
    %c0_71 = arith.constant 0 : index
    %180 = vector.load %arg2[%c22, %c0_71] : memref<27x256xf32, #tpu.memory_space<vmem>>, vector<1x256xf32>
    %181 = vector.broadcast %180 : vector<1x256xf32> to vector<16x256xf32>
    %182 = arith.mulf %179, %181 : vector<16x256xf32>
    %c0_72 = arith.constant 0 : index
    %c22_73 = arith.constant 22 : index
    %183 = vector.load %arg5[%c0_72, %c22_73] : memref<16x27xf32, #tpu.memory_space<vmem>>, vector<16x1xf32>
    %184 = vector.broadcast %183 : vector<16x1xf32> to vector<16x256xf32>
    %185 = arith.mulf %182, %184 : vector<16x256xf32>
    %186 = arith.addf %178, %185 : vector<16x256xf32>
    %c191_i32 = arith.constant 191 : i32
    %187 = tpu.dynamic_rotate %7 by %c191_i32 dim 1 : vector<16x256xf32>, i32 -> vector<16x256xf32>
    %c23 = arith.constant 23 : index
    %c0_74 = arith.constant 0 : index
    %188 = vector.load %arg2[%c23, %c0_74] : memref<27x256xf32, #tpu.memory_space<vmem>>, vector<1x256xf32>
    %189 = vector.broadcast %188 : vector<1x256xf32> to vector<16x256xf32>
    %190 = arith.mulf %187, %189 : vector<16x256xf32>
    %c0_75 = arith.constant 0 : index
    %c23_76 = arith.constant 23 : index
    %191 = vector.load %arg5[%c0_75, %c23_76] : memref<16x27xf32, #tpu.memory_space<vmem>>, vector<16x1xf32>
    %192 = vector.broadcast %191 : vector<16x1xf32> to vector<16x256xf32>
    %193 = arith.mulf %190, %192 : vector<16x256xf32>
    %194 = arith.addf %186, %193 : vector<16x256xf32>
    %c185_i32 = arith.constant 185 : i32
    %195 = tpu.dynamic_rotate %7 by %c185_i32 dim 1 : vector<16x256xf32>, i32 -> vector<16x256xf32>
    %c24 = arith.constant 24 : index
    %c0_77 = arith.constant 0 : index
    %196 = vector.load %arg2[%c24, %c0_77] : memref<27x256xf32, #tpu.memory_space<vmem>>, vector<1x256xf32>
    %197 = vector.broadcast %196 : vector<1x256xf32> to vector<16x256xf32>
    %198 = arith.mulf %195, %197 : vector<16x256xf32>
    %c0_78 = arith.constant 0 : index
    %c24_79 = arith.constant 24 : index
    %199 = vector.load %arg5[%c0_78, %c24_79] : memref<16x27xf32, #tpu.memory_space<vmem>>, vector<16x1xf32>
    %200 = vector.broadcast %199 : vector<16x1xf32> to vector<16x256xf32>
    %201 = arith.mulf %198, %200 : vector<16x256xf32>
    %202 = arith.addf %194, %201 : vector<16x256xf32>
    %c184_i32 = arith.constant 184 : i32
    %203 = tpu.dynamic_rotate %7 by %c184_i32 dim 1 : vector<16x256xf32>, i32 -> vector<16x256xf32>
    %c25 = arith.constant 25 : index
    %c0_80 = arith.constant 0 : index
    %204 = vector.load %arg2[%c25, %c0_80] : memref<27x256xf32, #tpu.memory_space<vmem>>, vector<1x256xf32>
    %205 = vector.broadcast %204 : vector<1x256xf32> to vector<16x256xf32>
    %206 = arith.mulf %203, %205 : vector<16x256xf32>
    %c0_81 = arith.constant 0 : index
    %c25_82 = arith.constant 25 : index
    %207 = vector.load %arg5[%c0_81, %c25_82] : memref<16x27xf32, #tpu.memory_space<vmem>>, vector<16x1xf32>
    %208 = vector.broadcast %207 : vector<16x1xf32> to vector<16x256xf32>
    %209 = arith.mulf %206, %208 : vector<16x256xf32>
    %210 = arith.addf %202, %209 : vector<16x256xf32>
    %c183_i32 = arith.constant 183 : i32
    %211 = tpu.dynamic_rotate %7 by %c183_i32 dim 1 : vector<16x256xf32>, i32 -> vector<16x256xf32>
    %c26 = arith.constant 26 : index
    %c0_83 = arith.constant 0 : index
    %212 = vector.load %arg2[%c26, %c0_83] : memref<27x256xf32, #tpu.memory_space<vmem>>, vector<1x256xf32>
    %213 = vector.broadcast %212 : vector<1x256xf32> to vector<16x256xf32>
    %214 = arith.mulf %211, %213 : vector<16x256xf32>
    %c0_84 = arith.constant 0 : index
    %c26_85 = arith.constant 26 : index
    %215 = vector.load %arg5[%c0_84, %c26_85] : memref<16x27xf32, #tpu.memory_space<vmem>>, vector<16x1xf32>
    %216 = vector.broadcast %215 : vector<16x1xf32> to vector<16x256xf32>
    %217 = arith.mulf %214, %216 : vector<16x256xf32>
    %218 = arith.addf %210, %217 : vector<16x256xf32>
    %c0_86 = arith.constant 0 : index
    %c0_87 = arith.constant 0 : index
    %219 = vector.load %arg6[%c0_86, %c0_87] : memref<16x1xf32, #tpu.memory_space<vmem>>, vector<16x1xf32>
    %220 = vector.broadcast %219 : vector<16x1xf32> to vector<16x256xf32>
    %221 = arith.addf %218, %220 : vector<16x256xf32>
    %222 = vector.extract_strided_slice %221 {offsets = [0, 0], sizes = [8, 256], strides = [1, 1]} : vector<16x256xf32> to vector<8x256xf32>
    %223 = vector.extract_strided_slice %221 {offsets = [8, 0], sizes = [8, 256], strides = [1, 1]} : vector<16x256xf32> to vector<8x256xf32>
    %cst_88 = arith.constant 5.000000e-01 : f32
    %224 = vector.broadcast %cst_88 : f32 to vector<8x256xf32>
    %225 = arith.mulf %224, %222 : vector<8x256xf32>
    %cst_89 = arith.constant 0.707106769 : f32
    %226 = vector.broadcast %cst_89 : f32 to vector<8x256xf32>
    %227 = arith.mulf %222, %226 : vector<8x256xf32>
    %228 = math.absf %227 : vector<8x256xf32>
    %cst_90 = arith.constant 0.327591091 : f32
    %229 = vector.broadcast %cst_90 : f32 to vector<8x256xf32>
    %230 = arith.mulf %229, %228 : vector<8x256xf32>
    %cst_91 = arith.constant 1.000000e+00 : f32
    %231 = vector.broadcast %cst_91 : f32 to vector<8x256xf32>
    %232 = arith.addf %231, %230 : vector<8x256xf32>
    %cst_92 = arith.constant 1.000000e+00 : f32
    %233 = vector.broadcast %cst_92 : f32 to vector<8x256xf32>
    %234 = arith.divf %233, %232 : vector<8x256xf32>
    %cst_93 = arith.constant 1.06140542 : f32
    %235 = vector.broadcast %cst_93 : f32 to vector<8x256xf32>
    %236 = arith.mulf %235, %234 : vector<8x256xf32>
    %cst_94 = arith.constant -1.45315206 : f32
    %237 = vector.broadcast %cst_94 : f32 to vector<8x256xf32>
    %238 = arith.addf %236, %237 : vector<8x256xf32>
    %239 = arith.mulf %238, %234 : vector<8x256xf32>
    %cst_95 = arith.constant 1.42141378 : f32
    %240 = vector.broadcast %cst_95 : f32 to vector<8x256xf32>
    %241 = arith.addf %239, %240 : vector<8x256xf32>
    %242 = arith.mulf %241, %234 : vector<8x256xf32>
    %cst_96 = arith.constant -0.284496725 : f32
    %243 = vector.broadcast %cst_96 : f32 to vector<8x256xf32>
    %244 = arith.addf %242, %243 : vector<8x256xf32>
    %245 = arith.mulf %244, %234 : vector<8x256xf32>
    %cst_97 = arith.constant 0.254829586 : f32
    %246 = vector.broadcast %cst_97 : f32 to vector<8x256xf32>
    %247 = arith.addf %245, %246 : vector<8x256xf32>
    %248 = arith.mulf %247, %234 : vector<8x256xf32>
    %249 = arith.mulf %228, %228 : vector<8x256xf32>
    %cst_98 = arith.constant 0.000000e+00 : f32
    %250 = vector.broadcast %cst_98 : f32 to vector<8x256xf32>
    %251 = arith.subf %250, %249 : vector<8x256xf32>
    %252 = math.exp %251 : vector<8x256xf32>
    %253 = arith.mulf %248, %252 : vector<8x256xf32>
    %cst_99 = arith.constant 1.000000e+00 : f32
    %254 = vector.broadcast %cst_99 : f32 to vector<8x256xf32>
    %255 = arith.subf %254, %253 : vector<8x256xf32>
    %cst_100 = arith.constant 0.000000e+00 : f32
    %256 = vector.broadcast %cst_100 : f32 to vector<8x256xf32>
    %257 = arith.cmpf olt, %227, %256 : vector<8x256xf32>
    %cst_101 = arith.constant 0.000000e+00 : f32
    %258 = vector.broadcast %cst_101 : f32 to vector<8x256xf32>
    %259 = arith.subf %258, %255 : vector<8x256xf32>
    %260 = arith.select %257, %259, %255 : vector<8x256xi1>, vector<8x256xf32>
    %cst_102 = arith.constant 1.000000e+00 : f32
    %261 = vector.broadcast %cst_102 : f32 to vector<8x256xf32>
    %262 = arith.addf %261, %260 : vector<8x256xf32>
    %263 = arith.mulf %225, %262 : vector<8x256xf32>
    %264 = arith.mulf %263, %223 : vector<8x256xf32>
    %265 = arith.truncf %264 : vector<8x256xf32> to vector<8x256xbf16>
    %c0_103 = arith.constant 0 : index
    %c0_104 = arith.constant 0 : index
    %266 = vector.load %arg7[%c0_103, %c0_104] : memref<4x8xbf16, #tpu.memory_space<vmem>>, vector<4x8xbf16>
    %cst_105 = arith.constant dense<0.000000e+00> : vector<4x256xf32>
    %267 = tpu.matmul %266, %265, %cst_105 {dimension_numbers = #tpu.dot_dimension_numbers<[1], [0], [0], [1], [0, 0, 1, 1], [], []>} : vector<4x8xbf16>, vector<8x256xbf16>, vector<4x256xf32> -> vector<4x256xf32>
    %c0_106 = arith.constant 0 : index
    %c0_107 = arith.constant 0 : index
    %268 = vector.load %arg8[%c0_106, %c0_107] : memref<4x1xf32, #tpu.memory_space<vmem>>, vector<4x1xf32>
    %269 = vector.broadcast %268 : vector<4x1xf32> to vector<4x256xf32>
    %270 = arith.addf %267, %269 : vector<4x256xf32>
    %c0_108 = arith.constant 0 : index
    %c0_109 = arith.constant 0 : index
    %c0_110 = arith.constant 0 : index
    %271 = vector.load %arg11[%c0_108, %c0_109, %c0_110] : memref<1x4x256xf32, #tpu.memory_space<vmem>>, vector<1x4x256xf32>
    %272 = vector.shape_cast %271 : vector<1x4x256xf32> to vector<4x256xf32>
    %273 = vector.shape_cast %270 : vector<4x256xf32> to vector<1x4x256xf32>
    tpu.vector_store %arg11[%c0_108, %c0_109, %c0_110], %273 {strides = array<i32>} : memref<1x4x256xf32, #tpu.memory_space<vmem>>, vector<1x4x256xf32>,
    %c0_111 = arith.constant 0 : index
    %c0_112 = arith.constant 0 : index
    %274 = vector.load %arg9[%c0_111, %c0_112] : memref<2x8xbf16, #tpu.memory_space<vmem>>, vector<2x8xbf16>
    %cst_113 = arith.constant dense<0.000000e+00> : vector<2x256xf32>
    %275 = tpu.matmul %274, %265, %cst_113 {dimension_numbers = #tpu.dot_dimension_numbers<[1], [0], [0], [1], [0, 0, 1, 1], [], []>} : vector<2x8xbf16>, vector<8x256xbf16>, vector<2x256xf32> -> vector<2x256xf32>
    %c0_114 = arith.constant 0 : index
    %c0_115 = arith.constant 0 : index
    %276 = vector.load %arg10[%c0_114, %c0_115] : memref<2x1xf32, #tpu.memory_space<vmem>>, vector<2x1xf32>
    %277 = vector.broadcast %276 : vector<2x1xf32> to vector<2x256xf32>
    %278 = arith.addf %275, %277 : vector<2x256xf32>
    %c0_116 = arith.constant 0 : index
    %c0_117 = arith.constant 0 : index
    %c0_118 = arith.constant 0 : index
    %279 = vector.load %arg12[%c0_116, %c0_117, %c0_118] : memref<1x2x256xf32, #tpu.memory_space<vmem>>, vector<1x2x256xf32>
    %280 = vector.shape_cast %279 : vector<1x2x256xf32> to vector<2x256xf32>
    %281 = vector.shape_cast %278 : vector<2x256xf32> to vector<1x2x256xf32>
    tpu.vector_store %arg12[%c0_116, %c0_117, %c0_118], %281 {strides = array<i32>} : memref<1x2x256xf32, #tpu.memory_space<vmem>>, vector<1x2x256xf32>,
    return
  }
  func.func @transform_0(%arg0: i32) -> (i32, i32, i32) {
    %c0_i32 = arith.constant 0 : i32
    %c0_i32_0 = arith.constant 0 : i32
    %c0_i32_1 = arith.constant 0 : i32
    return %arg0, %c0_i32, %c0_i32_0 : i32, i32, i32
  }
  func.func @transform_1(%arg0: i32) -> (i32, i32) {
    %c0_i32 = arith.constant 0 : i32
    %c0_i32_0 = arith.constant 0 : i32
    %c0_i32_1 = arith.constant 0 : i32
    return %c0_i32, %c0_i32_0 : i32, i32
  }
  func.func @transform_2(%arg0: i32) -> (i32, i32) {
    %c0_i32 = arith.constant 0 : i32
    %c0_i32_0 = arith.constant 0 : i32
    %c0_i32_1 = arith.constant 0 : i32
    return %c0_i32, %c0_i32_0 : i32, i32
  }
  func.func @transform_3(%arg0: i32) -> (i32, i32) {
    %c0_i32 = arith.constant 0 : i32
    %c0_i32_0 = arith.constant 0 : i32
    %c0_i32_1 = arith.constant 0 : i32
    return %c0_i32, %c0_i32_0 : i32, i32
  }
  func.func @transform_4(%arg0: i32) -> (i32, i32) {
    %c0_i32 = arith.constant 0 : i32
    %c0_i32_0 = arith.constant 0 : i32
    %c0_i32_1 = arith.constant 0 : i32
    return %c0_i32, %c0_i32_0 : i32, i32
  }
  func.func @transform_5(%arg0: i32) -> (i32, i32) {
    %c0_i32 = arith.constant 0 : i32
    %c0_i32_0 = arith.constant 0 : i32
    %c0_i32_1 = arith.constant 0 : i32
    return %c0_i32, %c0_i32_0 : i32, i32
  }
  func.func @transform_6(%arg0: i32) -> (i32, i32) {
    %c0_i32 = arith.constant 0 : i32
    %c0_i32_0 = arith.constant 0 : i32
    %c0_i32_1 = arith.constant 0 : i32
    return %c0_i32, %c0_i32_0 : i32, i32
  }
  func.func @transform_7(%arg0: i32) -> (i32, i32) {
    %c0_i32 = arith.constant 0 : i32
    %c0_i32_0 = arith.constant 0 : i32
    %c0_i32_1 = arith.constant 0 : i32
    return %c0_i32, %c0_i32_0 : i32, i32
  }
  func.func @transform_8(%arg0: i32) -> (i32, i32) {
    %c0_i32 = arith.constant 0 : i32
    %c0_i32_0 = arith.constant 0 : i32
    %c0_i32_1 = arith.constant 0 : i32
    return %c0_i32, %c0_i32_0 : i32, i32
  }
  func.func @transform_9(%arg0: i32) -> (i32, i32) {
    %c0_i32 = arith.constant 0 : i32
    %c0_i32_0 = arith.constant 0 : i32
    %c0_i32_1 = arith.constant 0 : i32
    return %c0_i32, %c0_i32_0 : i32, i32
  }
  func.func @transform_10(%arg0: i32) -> (i32, i32, i32) {
    %c0_i32 = arith.constant 0 : i32
    %c0_i32_0 = arith.constant 0 : i32
    %c0_i32_1 = arith.constant 0 : i32
    return %arg0, %c0_i32, %c0_i32_0 : i32, i32, i32
  }
  func.func @transform_11(%arg0: i32) -> (i32, i32, i32) {
    %c0_i32 = arith.constant 0 : i32
    %c0_i32_0 = arith.constant 0 : i32
    %c0_i32_1 = arith.constant 0 : i32
    return %arg0, %c0_i32, %c0_i32_0 : i32, i32, i32
  }
}

</mosaic_0001>

<bundles_post_ra>
// kernel: tpu_custom_call.1
= control target key start
LH: loop header
LB: loop body
LE: loop exit
PB: predicated region body
PF: predicated region fallthrough
CT: control target
= control target key end

     0   :  { %6 = vsyncpa [#allocation3], 0  ;;  %s128_s0 = inlined_call_operand.hbm [shape: f32[8,128], index: 0, kind: input, shape index: {}]   ;;  %s129_s1 = inlined_call_operand.hbm [shape: f32[8,128], index: 1, kind: output, shape index: {}]  }
   0x1   :  { %7 = vsyncpa [#allocation4], 0  ;;  %s91_s6 = smov [#allocation2]   ;;  %s43_s10 = scalar_lea.hbm %s128_s0, 128 }
   0x2   :  { %s14_s7 = sshll.u32 %s91_s6, 4  ;;  %p44_p0 = scmp.ne.s32.totalorder %s128_s0, %s43_s10  ;;  %s15_s7 = int_to_ptr.vmem [resolvable:$true] %s14_s7 }
   0x3   :  { %p47_p1 = scmp.lt.u32.totalorder %s43_s10, %s128_s0 }
   0x5   :  { %p49_p2 = pnand %p47_p1, %p44_p0 }
   0x7   :  { %52 = shalt.err (!%p49_p2)
}
   0x8   :  { %s53_s15 = scalar_lea.vmem %s15_s7, 128  ;;  %p58_p4 = scmp.lt.s32.totalorder %s15_s7, %s15_s7 }
   0x9   :  { %p54_p3 = scmp.ne.s32.totalorder %s15_s7, %s53_s15  ;;  %p59_p5 = scmp.lt.s32.totalorder %s53_s15, %s53_s15 }
   0xb   :  { %p60_p6 = por %p59_p5, %p58_p4 }
   0xd   :  { %p61_p7 = pnand %p60_p6, %p54_p3 }
   0xf   :  { %64 = shalt.err (!%p61_p7)
}
  0x10   :  { %17 = dma.hbm_to_vmem [thread:$0]  %s128_s0, 128, %s15_s7, [#allocation3]  }
  0x11   :  { %87 = dma.done.wait [#allocation3], 128  }
  0x12   :  { %88 = vsyncadd [#allocation3], 4294967168  ;;  %v21_v0 = vld [vmem:[#allocation2] sm:$0xff]  ;;  %s92_s18 = smov 5   ;;  %s93_s19 = smov [#allocation5]  }
  0x13   :  { %22 = vrot.lane.b32.xlu0 %v21_v0, %s92_s18  ;;  %s31_s20 = sshll.u32 %s93_s19, 4  ;;  %s32_s20 = int_to_ptr.vmem [resolvable:$true] %s31_s20 }
  0x14   :  { %s65_s21 = scalar_lea.vmem %s32_s20, 128  ;;  %p70_p9 = scmp.lt.s32.totalorder %s32_s20, %s32_s20 }
  0x15   :  { %p66_p8 = scmp.ne.s32.totalorder %s32_s20, %s65_s21  ;;  %p71_p10 = scmp.lt.s32.totalorder %s65_s21, %s65_s21 }
  0x17   :  { %p72_p11 = por %p71_p10, %p70_p9 }
  0x19   :  { %p73_p12 = pnand %p72_p11, %p66_p8 }
  0x85   :  { %v23_v1 = vpop.permute.xlu0 %22 }
  0x86   :  { %24 = vst [vmem:[#allocation5] sm:$0xff] %v23_v1 }
  0x87   :  { %76 = shalt.err (!%p73_p12)
}
  0x88   :  { %s77_s0 = scalar_lea.hbm %s129_s1, 128 }
  0x89   :  { %p78_p13 = scmp.ne.s32.totalorder %s129_s1, %s77_s0  ;;  %p81_p0 = scmp.lt.u32.totalorder %s77_s0, %s129_s1 }
  0x8b   :  { %p83_p1 = pnand %p81_p0, %p78_p13 }
  0x8d   :  { %86 = shalt.err (!%p83_p1)
}
  0x8e   :  { %34 = dma.vmem_to_hbm [thread:$0]  %s32_s20, 128, %s129_s1, [#allocation4]  }
  0x8f   :  { %89 = dma.done.wait [#allocation4], 128  }
  0x90   :  { %90 = vsyncadd [#allocation4], 4294967168 }
  0x91   :  { %38 = vsyncpa [#allocation3], 1 }
  0x92   :  { %39 = vsyncpa [#allocation4], 1 }

// kernel: tpu_custom_call.1
= control target key start
LH: loop header
LB: loop body
LE: loop exit
PB: predicated region body
PF: predicated region fallthrough
CT: control target
= control target key end

     0   :  { %6 = vsyncpa [#allocation3], 0  ;;  %s128_s0 = inlined_call_operand.hbm [shape: f32[8,128], index: 0, kind: input, shape index: {}]   ;;  %s129_s1 = inlined_call_operand.hbm [shape: f32[8,128], index: 1, kind: output, shape index: {}]  }
   0x1   :  { %7 = vsyncpa [#allocation4], 0  ;;  %s91_s6 = smov [#allocation2]   ;;  %s43_s10 = scalar_lea.hbm %s128_s0, 128 }
   0x2   :  { %s14_s7 = sshll.u32 %s91_s6, 4  ;;  %p44_p0 = scmp.ne.s32.totalorder %s128_s0, %s43_s10  ;;  %s15_s7 = int_to_ptr.vmem [resolvable:$true] %s14_s7 }
   0x3   :  { %p47_p1 = scmp.lt.u32.totalorder %s43_s10, %s128_s0 }
   0x5   :  { %p49_p2 = pnand %p47_p1, %p44_p0 }
   0x7   :  { %52 = shalt.err (!%p49_p2)
}
   0x8   :  { %s53_s15 = scalar_lea.vmem %s15_s7, 128  ;;  %p58_p4 = scmp.lt.s32.totalorder %s15_s7, %s15_s7 }
   0x9   :  { %p54_p3 = scmp.ne.s32.totalorder %s15_s7, %s53_s15  ;;  %p59_p5 = scmp.lt.s32.totalorder %s53_s15, %s53_s15 }
   0xb   :  { %p60_p6 = por %p59_p5, %p58_p4 }
   0xd   :  { %p61_p7 = pnand %p60_p6, %p54_p3 }
   0xf   :  { %64 = shalt.err (!%p61_p7)
}
  0x10   :  { %17 = dma.hbm_to_vmem [thread:$0]  %s128_s0, 128, %s15_s7, [#allocation3]  }
  0x11   :  { %87 = dma.done.wait [#allocation3], 128  }
  0x12   :  { %88 = vsyncadd [#allocation3], 4294967168  ;;  %v21_v0 = vld [vmem:[#allocation2] sm:$0xff]  ;;  %s92_s18 = smov 5   ;;  %s93_s19 = smov [#allocation5]  }
  0x13   :  { %22 = vrot.lane.b32.xlu0 %v21_v0, %s92_s18  ;;  %s31_s20 = sshll.u32 %s93_s19, 4  ;;  %s32_s20 = int_to_ptr.vmem [resolvable:$true] %s31_s20 }
  0x14   :  { %s65_s21 = scalar_lea.vmem %s32_s20, 128  ;;  %p70_p9 = scmp.lt.s32.totalorder %s32_s20, %s32_s20 }
  0x15   :  { %p66_p8 = scmp.ne.s32.totalorder %s32_s20, %s65_s21  ;;  %p71_p10 = scmp.lt.s32.totalorder %s65_s21, %s65_s21 }
  0x17   :  { %p72_p11 = por %p71_p10, %p70_p9 }
  0x19   :  { %p73_p12 = pnand %p72_p11, %p66_p8 }
  0x85   :  { %v23_v1 = vpop.permute.xlu0 %22 }
  0x86   :  { %24 = vst [vmem:[#allocation5] sm:$0xff] %v23_v1 }
  0x87   :  { %76 = shalt.err (!%p73_p12)
}
  0x88   :  { %s77_s0 = scalar_lea.hbm %s129_s1, 128 }
  0x89   :  { %p78_p13 = scmp.ne.s32.totalorder %s129_s1, %s77_s0  ;;  %p81_p0 = scmp.lt.u32.totalorder %s77_s0, %s129_s1 }
  0x8b   :  { %p83_p1 = pnand %p81_p0, %p78_p13 }
  0x8d   :  { %86 = shalt.err (!%p83_p1)
}
  0x8e   :  { %34 = dma.vmem_to_hbm [thread:$0]  %s32_s20, 128, %s129_s1, [#allocation4]  }
  0x8f   :  { %89 = dma.done.wait [#allocation4], 128  }
  0x90   :  { %90 = vsyncadd [#allocation4], 4294967168 }
  0x91   :  { %38 = vsyncpa [#allocation3], 1 }
  0x92   :  { %39 = vsyncpa [#allocation4], 1 }

// kernel: tpu_custom_call.1
= control target key start
LH: loop header
LB: loop body
LE: loop exit
PB: predicated region body
PF: predicated region fallthrough
CT: control target
= control target key end

     0   :  { %s3688_s0 = inlined_call_operand.vmem [shape: f32[2,4,256], index: 0, kind: input, shape index: {}]   ;;  %s3689_s1 = inlined_call_operand.hbm [shape: f32[27,256], index: 1, kind: input, shape index: {}]   ;;  %s3690_s2 = inlined_call_operand.vmem [shape: bf16[16,4], index: 2, kind: input, shape index: {}]   ;;  %s3691_s3 = inlined_call_operand.vmem [shape: f32[16,1], index: 3, kind: input, shape index: {}]   ;;  %s3692_s4 = inlined_call_operand.vmem [shape: f32[16,27], index: 4, kind: input, shape index: {}]   ;;  %s3693_s5 = inlined_call_operand.vmem [shape: f32[16,1], index: 5, kind: input, shape index: {}]   ;;  %s3694_s6 = inlined_call_operand.vmem [shape: bf16[4,8], index: 6, kind: input, shape index: {}]   ;;  %s3695_s7 = inlined_call_operand.vmem [shape: f32[4,1], index: 7, kind: input, shape index: {}]   ;;  %s3696_s8 = inlined_call_operand.vmem [shape: bf16[2,8], index: 8, kind: input, shape index: {}]   ;;  %s3697_s9 = inlined_call_operand.vmem [shape: f32[2,1], index: 9, kind: input, shape index: {}]   ;;  %s3698_s10 = inlined_call_operand.hbm [shape: f32[2,4,256], index: 10, kind: output, shape index: {0}]   ;;  %s3699_s11 = inlined_call_operand.hbm [shape: f32[2,2,256], index: 11, kind: output, shape index: {1}]  }
   0x1   :  { %3806 = sst [smem:[#allocation67_spill]] %s3688_s0 }
   0x2   :  { %3807 = sst [smem:[#allocation68_spill]] %s3689_s1 }
   0x3   :  { %3808 = sst [smem:[#allocation69_spill]] %s3690_s2 }
   0x4   :  { %17 = vsyncpa [#allocation3], 0 }
   0x5   :  { %18 = vsyncpa [#allocation4], 0 }
   0x6   :  { %20 = vsyncpa [#allocation4 + $0x1], 0 }
   0x7   :  { %21 = vsyncpa [#allocation7], 0 }
   0x8   :  { %23 = vsyncpa [#allocation7 + $0x1], 0  ;;  %s2352_s17 = smov 0   ;;  %s2354_s18 = smov 0  }
   0x9   :  { %s2356_s19 = smov 0   ;;  %s2358_s20 = smov 0  }
   0xa LB: > { %s2373_s21 = sadd.s32 4294967295, %s2241_s20   ;;  %s1925_s22 = sadd.s32 4294967294, %s2241_s20   ;;  %s2241_s20 = sphi %s2358_s20, %s3986_s20   ;;  %s2237_s19 = sphi %s2356_s19, %s3985_s19   ;;  %s2233_s18 = sphi %s2354_s18, %s3984_s18   ;;  %s2229_s17 = sphi %s2352_s17, %s3983_s17  }
   0xb   : > { %s2377_s23 = sadd.s32 1, %s2241_s20   ;;  %s251_s24 = sadd.s32 1, %s2237_s19 }
   0xc   : > { %s248_s25 = ssub.s32 %s2241_s20, %s2377_s23  ;;  %p261_p0 = scmp.ne.s32.totalorder %s2237_s19, %s2233_s18 }
   0xd   : > { %p249_p1 = scmp.eq.s32.totalorder %s248_s25, 0  ;;  %p262_p2 = scmp.eq.s32.totalorder %s2373_s21, 1 }
   0xe   : > { %p267_p3 = scmp.ne.s32.totalorder %s2233_s18, %s2229_s17  ;;  %p268_p4 = scmp.eq.s32.totalorder %s1925_s22, 1 }
   0xf   : > { %s2388_s26 = scalar_select %p249_p1, %s2237_s19, %s251_s24  }
  0x10   : > { %p2390_p5 = por %p262_p2, %p261_p0  ;;  %p2394_p6 = por %p268_p4, %p267_p3 }
  0x11   : > { %3809 = sst [smem:[#allocation11_spill]] %s2388_s26  ;;  %p1926_p7 = scmp.ge.s32.totalorder %s2241_s20, 1 }
  0x12   : > { %s3810_s27 = scalar_select %p2390_p5, 1, 0 }
  0x13   : > { %s3811_s28 = scalar_select %p2394_p6, 1, 0 }
  0x14   : > { %p301_p8 = scmp.lt.s32.totalorder %s2241_s20, 3  ;;  %p3700_p9 = scmp.eq.s32.totalorder %s2373_s21, 0 }
  0x15   : > { %s2243_s30 = smov [#allocation2]   ;;  %s3814_s1 = sld [smem:[#allocation68_spill]] }
  0x16   : > { %p2401_p10 = pnand %p1926_p7, %p301_p8  ;;  %s313_s12 = sshll.u32 %s2243_s30, 4  ;;  %s314_s12 = int_to_ptr.vmem [resolvable:$true] %s313_s12 }
  0x18   : > { %s3812_s29 = scalar_select %p2401_p10, 1, 0 }
  0x19   : > { %p1962_p11 = pneg %p2401_p10 }
  0x1b   : > { %p2409_p12 = pnand %p3700_p9, %p1962_p11  ;;  %s2115_s16 = scalar_lea.hbm %s3814_s1, 1024 }
  0x1c   : > { %p2116_p13 = scmp.ne.s32.totalorder %s3814_s1, %s2115_s16  ;;  %p2122_p3 = scmp.lt.u32.totalorder %s2115_s16, %s3814_s1 }
  0x1d   : > { %p2117_p0 = pneg %p2409_p12 }
  0x1f   : > { %p2118_p1 = pnand %p2117_p0, %p2116_p13 }
  0x21   : > { %p2119_p2 = pneg %p2118_p1 }
  0x23   : > { %p2124_p4 = pnand %p2122_p3, %p2119_p2 }
  0x25   : > { %2127 = shalt.err (!%p2124_p4)
}
  0x26   : > { %s2128_s26 = scalar_lea.vmem %s314_s12, 1024  ;;  %p2136_p9 = scmp.lt.s32.totalorder %s314_s12, %s314_s12 }
  0x27   : > { %p2129_p7 = scmp.ne.s32.totalorder %s314_s12, %s2128_s26  ;;  %p2137_p6 = scmp.lt.s32.totalorder %s2128_s26, %s2128_s26 }
  0x29   : > { %p2131_p8 = pnand %p2129_p7, %p2117_p0  ;;  %p2138_p5 = por %p2137_p6, %p2136_p9 }
  0x2b   : > { %p2132_p11 = pneg %p2131_p8 }
  0x2d   : > { %p2139_p10 = pnand %p2138_p5, %p2132_p11 }
  0x2f   : > { %2142 = shalt.err (!%p2139_p10)
}
  0x30   : > { %s2244_s14 = smov 256   ;;  %s2245_s15 = smov 16  }
  0x31   : > { %1965 = dma.hbm_to_vmem [thread:$0]  (!%p2409_p12), %s3814_s1, 1024, %s314_s12, [#allocation3], %s2244_s14, %s2244_s14, %s2245_s15  }
  0x32   : > { %p3815_p13 = scmp.ne.s32.totalorder %s3812_s29, 0 }
  0x34   : > { %361 = sbr.rel (%p3815_p13) target bundleno = 966 (0x3c6), region = 60 }
  0x3b   : > { %p3816_p1 = scmp.eq.s32.totalorder %s2373_s21, 0 }
  0x3d   : > { %2216 = dma.done.wait (%p3816_p1), [#allocation3], 1024   ;;  %p3817_p0 = pmov %p3816_p1 }
  0x3e   : > { %p406_p5 = scmp.lt.s32.totalorder %s2373_s21, 1  ;;  %v3731_v0 = vmov 0   ;;  %v2247_v1 = vmov 13   ;;  %s3818_s0 = sld [smem:[#allocation67_spill]]  ;;  %vm441_vm0 = vcmask 1041408   ;;  %v420_v5 = vld [vmem:[%s3691_s3] sm:$0xff] }
  0x3f   : > { %2218 = vsyncadd (%p3817_p0), [#allocation3], 4294966272  ;;  %480 = vmatprep.mubr.bf16.mxu0 %v3731_v0  ;;  %2055 = vset.pattern.permute.xlu0 %v3731_v0  ;;  %v2450_v6 = vld [vmem:[%s3692_s4] sm:$0xff]  ;;  %v421_v9 = vld [vmem:[%s3691_s3 + $0x8] sm:$0xff]  ;;  %s3819_s2 = sld [smem:[#allocation69_spill]]  ;;  %vm437_vm1 = vcmask 31744  }
  0x40   : > { %s407_s26 = scalar_select %p406_p5, %s2373_s21, 1  ;;  %1711 = vmatprep.mubr.bf16.mxu1 %v3731_v0  ;;  %2056 = vset.pattern.permute.xlu1 %v2247_v1  ;;  %v2248_v11 = vmov 2   ;;  %v2249_v12 = vmov 20   ;;  %v2250_v13 = vmov 4   ;;  %v3735_v14 = vmov 21   ;;  %v2480_v20 = vld [vmem:[%s3692_s4 + $0x8] sm:$0xff] }
  0x41   : > { %424 = vperm.xlu0 %2055, %v420_v5   ;;  %495 = vperm.xlu1 %2056, %v2450_v6   ;;  %v2252_v15 = vmov 12   ;;  %v3734_v16 = vmov 23   ;;  %v2254_v17 = vmov 14   ;;  %v3733_v18 = vmov 24   ;;  %v1587_v27 = vld [vmem:[%s3693_s5] sm:$0xff]  ;;  %s2272_s30 = smov 73  }
  0x42   : > { %s1951_s12 = sshll.u32 %s407_s26, 3  ;;  %v2256_v19 = vmov 15   ;;  %v2257_v21 = vmov 16   ;;  %v2258_v22 = vmov 25   ;;  %v2259_v23 = vmov 17   ;;  %s3716_s14 = smov 72  }
  0x43   : > { %v3732_v24 = vmov 26   ;;  %v2261_v25 = vmov 18   ;;  %v2262_v26 = vmov 19   ;;  %v2263_v28 = vmov 22   ;;  %s3715_s15 = smov 65   ;;  %s2275_s22 = smov 71  }
  0x44   : > { %s410_s16 = scalar_lea.vmem %s3818_s0, %s1951_s12  ;;  %v2264_v29 = vmov 1   ;;  %v2265_v30 = vmov 3   ;;  %v2266_v31 = vmov 5   ;;  %v2267_v32 = vmov 6   ;;  %s3723_s24 = smov 64  }
  0x45   : > { %v412_v2 = vld [vmem:[%s410_s16] sm:$0xff]  ;;  %429 = vperm.xlu0 %2055, %v421_v9   ;;  %2057 = vset.pattern.permute.xlu1 %v3731_v0  ;;  %v2268_v33 = vmov 7   ;;  %v2269_v34 = vmov 8   ;;  %v2270_v35 = vmov 9   ;;  %v2271_v36 = vmov 10   ;;  %s3721_s26 = smov 63  }
  0x46   : > { %v416_v3 = vcombine.high %v412_v2, %v412_v2  ;;  %v418_v4 = vpack.c.bf16 %v412_v2, %v412_v2  ;;  %v2105_v10 = vld [vmem:[%s3819_s2] sm:$0xff]   ;;  %539 = vperm.xlu1 %2057, %v2450_v6   ;;  %v2278_v46 = vmov 11   ;;  %s3717_s12 = smov 57   ;;  %s3719_s29 = smov 56  }
  0x47   : > { %s3703_s13 = smov 55   ;;  %s3705_s16 = smov 9  }
  0x48   : > { %v419_v7 = vpack.c.bf16 %v416_v3, %v416_v3  ;;  %v443_v8 = vsel %vm441_vm0, %v418_v4, 0  ;;  %s3707_s25 = smov 8   ;;  %s3848_s0 = smov 65  }
  0x49   : > { %2058 = vset.pattern.permute.xlu0 %v2248_v11  ;;  %p3980_p9 = scmp.ne.s32.totalorder %s3810_s27, 0 }
  0x4a   : > { %1936 = vmatprep.subr.msk.bf16.mxu0 %vm441_vm0, %v419_v7  ;;  %631 = vperm.xlu0 %2058, %v2450_v6  }
  0x4b   : > { %449 = vmatpush1.bf16.msra.mxu0 %v443_v8  ;;  %2067 = vset.pattern.permute.xlu1 %v2249_v12 }
  0x4c   : > { %1374 = vperm.xlu1 %2067, %v2450_v6  }
  0x4e   : > { %1937 = vmatmul.mubr.msk.bf16.vlgmr.msra.gmra.mrb[0].mxu0 %vm437_vm1, %v2105_v10  ;;  %2059 = vset.pattern.permute.xlu0 %v2250_v13 }
  0x4f   : > { %1767 = vmatprep.mubr.bf16.mxu0 %v3731_v0  ;;  %723 = vperm.xlu0 %2059, %v2450_v6  }
  0x50   : > { %2068 = vset.pattern.permute.xlu1 %v3735_v14 }
  0x51   : > { %1407 = vperm.xlu1 %2068, %v2450_v6  }
  0x53   : > { %2060 = vset.pattern.permute.xlu0 %v2252_v15 }
  0x54   : > { %1091 = vperm.xlu0 %2060, %v2450_v6  }
  0x55   : > { %2070 = vset.pattern.permute.xlu1 %v3734_v16  ;;  %v522_v16 = vld [vmem:[#allocation2] ss:$8 sm:$0x3] }
  0x56   : > { %1473 = vperm.xlu1 %2070, %v2450_v6  }
  0x58   : > { %2061 = vset.pattern.permute.xlu0 %v2254_v17 }
  0x59   : > { %1137 = vperm.xlu0 %2061, %v2450_v6  }
  0x5a   : > { %2071 = vset.pattern.permute.xlu1 %v3733_v18 }
  0x5b   : > { %1506 = vperm.xlu1 %2071, %v2450_v6  }
  0x5d   : > { %2062 = vset.pattern.permute.xlu0 %v2256_v19 }
  0x5e   : > { %1183 = vperm.xlu0 %2062, %v2450_v6  }
  0x5f   : > { %2074 = vset.pattern.permute.xlu1 %v3731_v0 }
  0x60   : > { %543 = vperm.xlu1 %2074, %v2480_v20  }
  0x62   : > { %2063 = vset.pattern.permute.xlu0 %v2257_v21 }
  0x63   : > { %1229 = vperm.xlu0 %2063, %v2450_v6  }
  0x64   : > { %2075 = vset.pattern.permute.xlu1 %v2258_v22 }
  0x65   : > { %1539 = vperm.xlu1 %2075, %v2450_v6  }
  0x67   : > { %2064 = vset.pattern.permute.xlu0 %v2259_v23 }
  0x68   : > { %1275 = vperm.xlu0 %2064, %v2450_v6  }
  0x69   : > { %2077 = vset.pattern.permute.xlu1 %v3732_v24 }
  0x6a   : > { %1572 = vperm.xlu1 %2077, %v2450_v6  }
  0x6c   : > { %2065 = vset.pattern.permute.xlu0 %v2261_v25 }
  0x6d   : > { %1308 = vperm.xlu0 %2065, %v2450_v6  }
  0x6e   : > { %2078 = vset.pattern.permute.xlu1 %v2248_v11 }
  0x6f   : > { %635 = vperm.xlu1 %2078, %v2480_v20  }
  0x71   : > { %2066 = vset.pattern.permute.xlu0 %v2262_v26 }
  0x72   : > { %1341 = vperm.xlu0 %2066, %v2450_v6  }
  0x73   : > { %2080 = vset.pattern.permute.xlu1 %v3731_v0 }
  0x74   : > { %1591 = vperm.xlu1 %2080, %v1587_v27  }
  0x76   : > { %2069 = vset.pattern.permute.xlu0 %v2263_v28 }
  0x77   : > { %1440 = vperm.xlu0 %2069, %v2450_v6  }
  0x78   : > { %2081 = vset.pattern.permute.xlu1 %v2250_v13 }
  0x79   : > { %727 = vperm.xlu1 %2081, %v2480_v20  }
  0x7b   : > { %2072 = vset.pattern.permute.xlu0 %v2247_v1 }
  0x7c   : > { %500 = vperm.xlu0 %2072, %v2480_v20  }
  0x7d   : > { %2095 = vset.pattern.permute.xlu1 %v2249_v12 }
  0x80   : > { %2073 = vset.pattern.permute.xlu0 %v2264_v29 }
  0x81   : > { %585 = vperm.xlu0 %2073, %v2450_v6  }
  0x85   : > { %589 = vperm.xlu0 %2073, %v2480_v20  }
  0x89   : > { %2076 = vset.pattern.permute.xlu0 %v2265_v30 }
  0x8a   : > { %677 = vperm.xlu0 %2076, %v2450_v6  }
  0x8e   : > { %681 = vperm.xlu0 %2076, %v2480_v20  }
  0x92   : > { %2079 = vset.pattern.permute.xlu0 %v2266_v31 }
  0x93   : > { %769 = vperm.xlu0 %2079, %v2450_v6  }
  0x97   : > { %773 = vperm.xlu0 %2079, %v2480_v20  }
  0x9b   : > { %2082 = vset.pattern.permute.xlu0 %v2267_v32 }
  0x9c   : > { %815 = vperm.xlu0 %2082, %v2450_v6  }
  0xa0   : > { %819 = vperm.xlu0 %2082, %v2480_v20  }
  0xa4   : > { %2083 = vset.pattern.permute.xlu0 %v2268_v33 }
  0xa5   : > { %861 = vperm.xlu0 %2083, %v2450_v6  }
  0xa9   : > { %865 = vperm.xlu0 %2083, %v2480_v20  }
  0xad   : > { %2084 = vset.pattern.permute.xlu0 %v2269_v34 }
  0xae   : > { %907 = vperm.xlu0 %2084, %v2450_v6  }
  0xb2   : > { %911 = vperm.xlu0 %2084, %v2480_v20  }
  0xb6   : > { %2085 = vset.pattern.permute.xlu0 %v2270_v35 }
  0xb7   : > { %953 = vperm.xlu0 %2085, %v2450_v6  }
  0xbb   : > { %957 = vperm.xlu0 %2085, %v2480_v20  }
  0xbf   : > { %2086 = vset.pattern.permute.xlu0 %v2271_v36 }
  0xc0   : > { %999 = vperm.xlu0 %2086, %v2450_v6   ;;  %v2521_v37 = vpop.permute.xlu0 %424  ;;  %v2571_v47 = vpop.permute.xlu1 %495 }
  0xc4   : > { %v430_v41 = vpop.permute.xlu0 %429 }
  0xc5   : > { %v2581_v49 = vpop.permute.xlu1 %539 }
  0xc9   : > { %v2576_v48 = vpop.permute.xlu0 %631 }
  0xcb   : > { %v2589_v51 = vpop.permute.xlu1 %1374 }
  0xcc   : > { %3820 = vst [vmem:[#allocation12_spill] sm:$0xff] %v2589_v51 }
  0xce   : > { %v2587_v50 = vpop.permute.xlu0 %723 }
  0xd0   : > { %v2599_v53 = vpop.permute.xlu1 %1407 }
  0xd1   : > { %3821 = vst [vmem:[#allocation13_spill] sm:$0xff] %v2599_v53 }
  0xd3   : > { %v2595_v52 = vpop.permute.xlu0 %1091 }
  0xd5   : > { %v2611_v56 = vpop.permute.xlu1 %1473 }
  0xd6   : > { %3822 = vst [vmem:[#allocation14_spill] sm:$0xff] %v2611_v56 }
  0xd8   : > { %v2605_v54 = vpop.permute.xlu0 %1137 }
  0xda   : > { %v2622_v58 = vpop.permute.xlu1 %1506 }
  0xdb   : > { %3823 = vst [vmem:[#allocation15_spill] sm:$0xff] %v2622_v58 }
  0xdd   : > { %v2617_v57 = vpop.permute.xlu0 %1183 }
  0xdf   : > { %v2630_v60 = vpop.permute.xlu1 %543 }
  0xe0   : > { %3824 = vst [vmem:[#allocation16_spill] sm:$0xff] %v2630_v60  ;;  %v752_v60 = vld [vmem:[#allocation2 + $0x5] ss:$8 sm:$0x3] }
  0xe2   : > { %v2628_v59 = vpop.permute.xlu0 %1229 }
  0xe4   : > { %v2638_v62 = vpop.permute.xlu1 %1539 }
  0xe5   : > { %3825 = vst [vmem:[#allocation17_spill] sm:$0xff] %v2638_v62 }
  0xe7   : > { %v2634_v61 = vpop.permute.xlu0 %1275 }
  0xe9   : > { %v2644_v1 = vpop.permute.xlu1 %1572 }
  0xea   : > { %3826 = vst [vmem:[#allocation18_spill] sm:$0xff] %v2644_v1 }
  0xec   : > { %v2642_v63 = vpop.permute.xlu0 %1308 }
  0xee   : > { %v2652_v3 = vpop.permute.xlu1 %635 }
  0xef   : > { %3828 = vst [vmem:[#allocation20_spill] sm:$0xff] %v2652_v3 }
  0xf1   : > { %v2648_v2 = vpop.permute.xlu0 %1341 }
  0xf2   : > { %3827 = vst [vmem:[#allocation19_spill] sm:$0xff] %v2648_v2 }
  0xf3   : > { %v2658_v5 = vpop.permute.xlu1 %1591 }
  0xf4   : > { %3831 = vst [vmem:[#allocation22_spill] sm:$0xff] %v2658_v5  ;;  %v568_v5 = vld [vmem:[#allocation2 + $0x1] ss:$8 sm:$0x3] }
  0xf6   : > { %v2656_v4 = vpop.permute.xlu0 %1440 }
  0xf7   : > { %3830 = vst [vmem:[#allocation21_spill] sm:$0xff] %v2656_v4 }
  0xf8   : > { %v2666_v7 = vpop.permute.xlu1 %727 }
  0xf9   : > { %3834 = vst [vmem:[#allocation23_spill] sm:$0xff] %v2666_v7 }
 0x121   : > { %v482_v38 = vpop.f32.mrb[0].mxu0 }
 0x122   : > { %v2524_v39 = vadd.f32 %v482_v38, %v2521_v37  ;;  %v2526_v40 = vpop.f32.mrb[1].mxu0 }
 0x123   : > { %v486_v42 = vpop.f32.mrb[2].mxu0  ;;  %v2609_v55 = vadd.f32 %v2526_v40, %v2521_v37  ;;  %v515_v40 = vlaneseq }
 0x124   : > { %v2528_v43 = vadd.f32 %v486_v42, %v430_v41  ;;  %v488_v44 = vpop.f32.mrb[3].mxu0  ;;  %507 = vrot.lane.b32.xlu1 %v2524_v39, %s2272_s30 }
 0x125   : > { %v2538_v45 = vadd.f32 %v488_v44, %v430_v41  ;;  %v525_v44 = vshrl.u32 %v515_v40, 7 }
 0x126   : > { %556 = vrot.lane.b32.xlu0 %v2528_v43, %s3716_s14 }
 0x127   : > { %v2768_v14 = vsub.s32 1, %v525_v44 }
 0x128   : > { %554 = vrot.lane.b32.xlu1 %v2524_v39, %s3716_s14 }
 0x12a   : > { %648 = vrot.lane.b32.xlu0 %v2528_v43, %s3715_s15 }
 0x12c   : > { %600 = vrot.lane.b32.xlu1 %v2524_v39, %s2275_s22 }
 0x12e   : > { %513 = vrot.lane.b32.xlu0 %v2538_v45, %s2272_s30 }
 0x130   : > { %646 = vrot.lane.b32.xlu1 %v2524_v39, %s3715_s15 }
 0x132   : > { %606 = vrot.lane.b32.xlu0 %v2538_v45, %s2275_s22 }
 0x134   : > { %692 = vrot.lane.b32.xlu1 %v2524_v39, %s3723_s24 }
 0x136   : > { %1003 = vperm.xlu0 %2086, %v2480_v20  }
 0x138   : > { %738 = vrot.lane.b32.xlu1 %v2524_v39, %s3721_s26 }
 0x13a   : > { %2087 = vset.pattern.permute.xlu0 %v2278_v46  ;;  %v2762_v46 = vand.u32 127, %v515_v40 }
 0x13b   : > { %1045 = vperm.xlu0 %2087, %v2450_v6   ;;  %v2662_v6 = vpop.permute.xlu0 %500 }
 0x13c   : > { %784 = vrot.lane.b32.xlu1 %v2524_v39, %s3717_s12  ;;  %vm517_vm2 = vcmp.lt.s32.totalorder %v2762_v46, 73  ;;  %vm562_vm3 = vcmp.lt.s32.totalorder %v2762_v46, 72  ;;  %vm608_vm4 = vcmp.lt.s32.totalorder %v2762_v46, 71  ;;  %vm654_vm5 = vcmp.lt.s32.totalorder %v2762_v46, 65 }
 0x13d   : > { %vm700_vm6 = vcmp.lt.s32.totalorder %v2762_v46, 64  ;;  %vm746_vm7 = vcmp.lt.s32.totalorder %v2762_v46, 63  ;;  %vm792_vm8 = vcmp.lt.s32.totalorder %v2762_v46, 57  ;;  %vm838_vm9 = vcmp.lt.s32.totalorder %v2762_v46, 56 }
 0x13e   : > { %vm884_vm10 = vcmp.lt.s32.totalorder %v2762_v46, 55  ;;  %vm930_vm11 = vcmp.lt.s32.totalorder %v2762_v46, 9  ;;  %vm976_vm12 = vcmp.lt.s32.totalorder %v2762_v46, 8  ;;  %vm1022_vm13 = vcmp.lt.s32.totalorder %v2762_v46, 7 }
 0x13f   : > { %1049 = vperm.xlu0 %2087, %v2480_v20   ;;  %v2668_v8 = vpop.permute.xlu0 %585  ;;  %vm1068_vm14 = vcmp.lt.s32.totalorder %v2762_v46, 1  ;;  %vm1114_vm15 = vcmp.lt.s32.totalorder %v2762_v46, 127  ;;  %vm3778_vm0 = vcmp.lt.s32.totalorder %v2762_v46, 121  ;;  %vm1206_vm1 = vcmp.lt.s32.totalorder %v2762_v46, 120 }
 0x140   : > { %830 = vrot.lane.b32.xlu1 %v2524_v39, %s3719_s29 }
 0x143   : > { %2088 = vset.pattern.permute.xlu0 %v2252_v15  ;;  %v2676_v10 = vpop.permute.xlu0 %589 }
 0x144   : > { %876 = vrot.lane.b32.xlu1 %v2524_v39, %s3703_s13  ;;  %1095 = vperm.xlu0 %2088, %v2480_v20   ;;  %s3709_s13 = smov 7   ;;  %3837 = vst [vmem:[#allocation24_spill] sm:$0xff] %v2676_v10 }
 0x147   : > { %v2684_v13 = vpop.permute.xlu0 %677 }
 0x148   : > { %922 = vrot.lane.b32.xlu1 %v2524_v39, %s3705_s16  ;;  %2089 = vset.pattern.permute.xlu0 %v2254_v17  ;;  %s3711_s16 = smov 1  }
 0x149   : > { %1141 = vperm.xlu0 %2089, %v2480_v20  }
 0x14b   : > { %v2692_v17 = vpop.permute.xlu0 %681 }
 0x14c   : > { %968 = vrot.lane.b32.xlu1 %v2524_v39, %s3707_s25  ;;  %s3713_s25 = smov 127   ;;  %3839 = vst [vmem:[#allocation25_spill] sm:$0xff] %v2692_v17  ;;  %v2799_v17 = vrot.slane %v568_v5, %v2768_v14 }
 0x14d   : > { %2090 = vset.pattern.permute.xlu0 %v2256_v19 }
 0x14e   : > { %1187 = vperm.xlu0 %2090, %v2480_v20   ;;  %3854 = vst [vmem:[#allocation34_spill] sm:$0xff] %v2799_v17 }
 0x150   : > { %1014 = vrot.lane.b32.xlu1 %v2524_v39, %s3709_s13  ;;  %s3729_s13 = smov 121  }
 0x152   : > { %2091 = vset.pattern.permute.xlu0 %v2257_v21  ;;  %v2700_v21 = vpop.permute.xlu0 %769 }
 0x153   : > { %1233 = vperm.xlu0 %2091, %v2480_v20  }
 0x154   : > { %1060 = vrot.lane.b32.xlu1 %v2524_v39, %s3711_s16  ;;  %s3725_s16 = smov 120  }
 0x157   : > { %2092 = vset.pattern.permute.xlu0 %v2259_v23  ;;  %v2708_v23 = vpop.permute.xlu0 %773 }
 0x158   : > { %1106 = vrot.lane.b32.xlu1 %v2524_v39, %s3713_s25  ;;  %1279 = vperm.xlu0 %2092, %v2480_v20   ;;  %s3727_s25 = smov 119   ;;  %3840 = vst [vmem:[#allocation26_spill] sm:$0xff] %v2708_v23 }
 0x15b   : > { %v2716_v27 = vpop.permute.xlu0 %815 }
 0x15c   : > { %1152 = vrot.lane.b32.xlu1 %v2524_v39, %s3729_s13  ;;  %2093 = vset.pattern.permute.xlu0 %v2261_v25 }
 0x15d   : > { %1312 = vperm.xlu0 %2093, %v2480_v20  }
 0x15f   : > { %v2724_v29 = vpop.permute.xlu0 %819 }
 0x160   : > { %1198 = vrot.lane.b32.xlu1 %v2524_v39, %s3725_s16  ;;  %3844 = vst [vmem:[#allocation27_spill] sm:$0xff] %v2724_v29  ;;  %v614_v29 = vld [vmem:[#allocation2 + $0x2] ss:$8 sm:$0x3] }
 0x161   : > { %2094 = vset.pattern.permute.xlu0 %v2262_v26  ;;  %v2819_v62 = vrot.slane %v614_v29, %v2768_v14 }
 0x162   : > { %1345 = vperm.xlu0 %2094, %v2480_v20  }
 0x163   : > { %v2732_v32 = vpop.permute.xlu0 %861  ;;  %3856 = vst [vmem:[#allocation36_spill] sm:$0xff] %v2819_v62 }
 0x164   : > { %1244 = vrot.lane.b32.xlu1 %v2524_v39, %s3727_s25 }
 0x166   : > { %2097 = vset.pattern.permute.xlu0 %v2263_v28 }
 0x167   : > { %1444 = vperm.xlu0 %2097, %v2480_v20   ;;  %v2740_v34 = vpop.permute.xlu0 %865 }
 0x168   : > { %511 = vrot.lane.b32.xlu1 %v2609_v55, %s2272_s30  ;;  %3847 = vst [vmem:[#allocation28_spill] sm:$0xff] %v2740_v34  ;;  %v2778_v34 = vrot.slane %v522_v16, %v2768_v14 }
 0x16a   : > { %3851 = vst [vmem:[#allocation31_spill] sm:$0xff] %v2778_v34 }
 0x16b   : > { %2100 = vset.pattern.permute.xlu0 %v2258_v22  ;;  %v2748_v37 = vpop.permute.xlu0 %907 }
 0x16c   : > { %558 = vrot.lane.b32.xlu1 %v2609_v55, %s3716_s14  ;;  %1543 = vperm.xlu0 %2100, %v2480_v20   ;;  %s3832_s14 = smov 9  }
 0x16f   : > { %v2756_v41 = vpop.permute.xlu0 %911 }
 0x170   : > { %604 = vrot.lane.b32.xlu1 %v2609_v55, %s2275_s22  ;;  %2103 = vset.pattern.permute.xlu0 %v3731_v0  ;;  %3849 = vst [vmem:[#allocation29_spill] sm:$0xff] %v2756_v41  ;;  %v2764_v0 = vsub.s32 0, %v525_v44 }
 0x172   : > { %v2774_v41 = vrot.slane %v522_v16, %v2764_v0  ;;  %v2791_v7 = vrot.slane %v568_v5, %v2764_v0  ;;  %v2814_v1 = vrot.slane %v614_v29, %v2764_v0 }
 0x173   : > { %v2766_v18 = vpop.permute.xlu0 %953 }
 0x174   : > { %650 = vrot.lane.b32.xlu1 %v2609_v55, %s3715_s15  ;;  %s3829_s15 = smov 55   ;;  %3850 = vst [vmem:[#allocation30_spill] sm:$0xff] %v2774_v41  ;;  %3852 = vst [vmem:[#allocation32_spill] sm:$0xff] %v2791_v7 }
 0x175   : > { %3855 = vst [vmem:[#allocation35_spill] sm:$0xff] %v2814_v1 }
 0x177   : > { %v2796_v16 = vpop.permute.xlu0 %957 }
 0x178   : > { %696 = vrot.lane.b32.xlu1 %v2609_v55, %s3723_s24  ;;  %s3838_s24 = smov 127   ;;  %3853 = vst [vmem:[#allocation33_spill] sm:$0xff] %v2796_v16 }
 0x17b   : > { %v2850_v2 = vpop.permute.xlu0 %999 }
 0x17c   : > { %742 = vrot.lane.b32.xlu1 %v2609_v55, %s3721_s26  ;;  %s3836_s26 = smov 1  }
 0x180   : > { %788 = vrot.lane.b32.xlu1 %v2609_v55, %s3717_s12  ;;  %s3833_s12 = smov 8  }
 0x184   : > { %834 = vrot.lane.b32.xlu1 %v2609_v55, %s3719_s29  ;;  %s3835_s29 = smov 7  }
 0x188   : > { %880 = vrot.lane.b32.xlu1 %v2609_v55, %s3829_s15 }
 0x18c   : > { %926 = vrot.lane.b32.xlu1 %v2609_v55, %s3832_s14 }
 0x190   : > { %972 = vrot.lane.b32.xlu1 %v2609_v55, %s3833_s12 }
 0x194   : > { %1018 = vrot.lane.b32.xlu1 %v2609_v55, %s3835_s29 }
 0x196   : > { %v2672_v9 = vpop.permute.xlu1 %507 }
 0x198   : > { %1064 = vrot.lane.b32.xlu1 %v2609_v55, %s3836_s26 }
 0x19a   : > { %v2678_v11 = vpop.permute.xlu1 %554 }
 0x19c   : > { %1110 = vrot.lane.b32.xlu1 %v2609_v55, %s3838_s24 }
 0x19e   : > { %v2682_v12 = vpop.permute.xlu1 %600 }
 0x1a0   : > { %1156 = vrot.lane.b32.xlu1 %v2609_v55, %s3729_s13  ;;  %s3846_s13 = smov 72  }
 0x1a2   : > { %v2688_v15 = vpop.permute.xlu1 %646 }
 0x1a4   : > { %1202 = vrot.lane.b32.xlu1 %v2609_v55, %s3725_s16  ;;  %s3841_s16 = smov 64  }
 0x1a6   : > { %v2694_v19 = vpop.permute.xlu1 %692 }
 0x1a8   : > { %1248 = vrot.lane.b32.xlu1 %v2609_v55, %s3727_s25  ;;  %s3842_s25 = smov 63  }
 0x1aa   : > { %v2698_v20 = vpop.permute.xlu1 %738 }
 0x1ac   : > { %509 = vrot.lane.b32.xlu1 %v2528_v43, %s2272_s30  ;;  %s3843_s30 = smov 57  }
 0x1ae   : > { %v2704_v22 = vpop.permute.xlu1 %784 }
 0x1b0   : > { %602 = vrot.lane.b32.xlu1 %v2528_v43, %s2275_s22  ;;  %s3845_s22 = smov 56  }
 0x1b2   : > { %v2710_v25 = vpop.permute.xlu1 %830 }
 0x1b4   : > { %694 = vrot.lane.b32.xlu1 %v2528_v43, %s3841_s16 }
 0x1b6   : > { %v2714_v26 = vpop.permute.xlu1 %876 }
 0x1b8   : > { %740 = vrot.lane.b32.xlu1 %v2528_v43, %s3842_s25 }
 0x1ba   : > { %v2720_v28 = vpop.permute.xlu1 %922 }
 0x1bc   : > { %786 = vrot.lane.b32.xlu1 %v2528_v43, %s3843_s30 }
 0x1be   : > { %v2726_v30 = vpop.permute.xlu1 %968 }
 0x1c0   : > { %832 = vrot.lane.b32.xlu1 %v2528_v43, %s3845_s22 }
 0x1c2   : > { %v2730_v31 = vpop.permute.xlu1 %1014 }
 0x1c4   : > { %878 = vrot.lane.b32.xlu1 %v2528_v43, %s3829_s15 }
 0x1c6   : > { %v2736_v33 = vpop.permute.xlu1 %1060 }
 0x1c8   : > { %560 = vrot.lane.b32.xlu1 %v2538_v45, %s3846_s13 }
 0x1ca   : > { %v2742_v35 = vpop.permute.xlu1 %1106 }
 0x1cc   : > { %652 = vrot.lane.b32.xlu1 %v2538_v45, %s3848_s0  ;;  %s3876_s0 = smov 121  }
 0x1ce   : > { %v2746_v36 = vpop.permute.xlu1 %1152 }
 0x1d0   : > { %698 = vrot.lane.b32.xlu1 %v2538_v45, %s3841_s16 }
 0x1d2   : > { %v2752_v38 = vpop.permute.xlu1 %1198 }
 0x1d4   : > { %744 = vrot.lane.b32.xlu1 %v2538_v45, %s3842_s25  ;;  %s1953_s25 = sshll.u32 %s2373_s21, 6 }
 0x1d6   : > { %v2758_v42 = vpop.permute.xlu1 %1244 }
 0x1d8   : > { %790 = vrot.lane.b32.xlu1 %v2538_v45, %s3843_s30 }
 0x1da   : > { %v512_v24 = vpop.permute.xlu1 %511 }
 0x1db   : > { %v2783_v44 = vsel %vm517_vm2, %v512_v24, %v2672_v9  ;;  %v2788_v23 = vsel %vm517_vm2, %v2672_v9, %v512_v24  ;;  %v660_v24 = vld [vmem:[#allocation2 + $0x3] ss:$8 sm:$0x3] }
 0x1dc   : > { %836 = vrot.lane.b32.xlu1 %v2538_v45, %s3845_s22  ;;  %v534_v9 = vmul.f32 %v2774_v41, %v2783_v44  ;;  %v535_v5 = vmul.f32 %v2778_v34, %v2788_v23  ;;  %v2837_v29 = vrot.slane %v660_v24, %v2764_v0 }
 0x1de   : > { %v559_v40 = vpop.permute.xlu1 %558  ;;  %3858 = vst [vmem:[#allocation38_spill] sm:$0xff] %v2837_v29  ;;  %v546_v53 = vmul.f32 %v2581_v49, %v534_v9 }
 0x1df   : > { %v2804_v3 = vsel %vm562_vm3, %v559_v40, %v2678_v11  ;;  %v2811_v10 = vsel %vm562_vm3, %v2678_v11, %v559_v40  ;;  %v503_v40 = vmul.f32 %v2571_v47, %v2524_v39  ;;  %v547_v39 = vmul.f32 %v2581_v49, %v535_v5 }
 0x1e0   : > { %882 = vrot.lane.b32.xlu1 %v2538_v45, %s3829_s15  ;;  %v580_v56 = vmul.f32 %v2791_v7, %v2804_v3  ;;  %v581_v4 = vmul.f32 %v2799_v17, %v2811_v10  ;;  %v706_v7 = vld [vmem:[#allocation2 + $0x4] ss:$8 sm:$0x3]  ;;  %s3887_s15 = smov 119  }
 0x1e1   : > { %v2871_v49 = vrot.slane %v706_v7, %v2764_v0  ;;  %v2874_v5 = vrot.slane %v706_v7, %v2768_v14  ;;  %v2887_v7 = vrot.slane %v752_v60, %v2768_v14 }
 0x1e2   : > { %v605_v16 = vpop.permute.xlu1 %604 }
 0x1e3   : > { %v2824_v58 = vsel %vm608_vm4, %v605_v16, %v2682_v12  ;;  %v2831_v11 = vsel %vm608_vm4, %v2682_v12, %v605_v16  ;;  %v2847_v16 = vrot.slane %v660_v24, %v2768_v14  ;;  %3861 = vst [vmem:[#allocation41_spill] sm:$0xff] %v2887_v7 }
 0x1e4   : > { %3857 = vst [vmem:[#allocation37_spill] sm:$0xff] %v2824_v58  ;;  %924 = vrot.lane.b32.xlu1 %v2528_v43, %s3832_s14  ;;  %v626_v12 = vmul.f32 %v2814_v1, %v2824_v58  ;;  %v627_v17 = vmul.f32 %v2819_v62, %v2831_v11  ;;  %v592_v1 = vmul.f32 %v2668_v8, %v580_v56 }
 0x1e5   : > { %v504_v62 = vmul.f32 %v2571_v47, %v2609_v55  ;;  %v2881_v56 = vrot.slane %v752_v60, %v2764_v0 }
 0x1e6   : > { %v651_v51 = vpop.permute.xlu1 %650  ;;  %v639_v47 = vmul.f32 %v2576_v48, %v627_v17 }
 0x1e7   : > { %v2858_v9 = vsel %vm654_vm5, %v2688_v15, %v651_v51  ;;  %v2863_v24 = vsel %vm654_vm5, %v651_v51, %v2688_v15  ;;  %v593_v51 = vmul.f32 %v2668_v8, %v581_v4  ;;  %3860 = vst [vmem:[#allocation40_spill] sm:$0xff] %v2881_v56  ;;  %v550_v15 = vadd.f32 %v546_v53, %v503_v40  ;;  %v798_v4 = vld [vmem:[#allocation2 + $0x6] ss:$8 sm:$0x3] }
 0x1e8   : > { %3859 = vst [vmem:[#allocation39_spill] sm:$0xff] %v2863_v24  ;;  %v672_v34 = vmul.f32 %v2837_v29, %v2863_v24  ;;  %928 = vrot.lane.b32.xlu1 %v2538_v45, %s3832_s14  ;;  %v638_v29 = vmul.f32 %v2576_v48, %v626_v12  ;;  %v673_v24 = vmul.f32 %v2847_v16, %v2858_v9  ;;  %s3881_s14 = smov 120  }
 0x1e9   : > { %v551_v58 = vadd.f32 %v547_v39, %v504_v62  ;;  %v596_v8 = vadd.f32 %v592_v1, %v550_v15  ;;  %v2907_v62 = vpop.permute.xlu0 %556  ;;  %v2913_v12 = vrot.slane %v798_v4, %v2764_v0 }
 0x1ea   : > { %v697_v41 = vpop.permute.xlu1 %696  ;;  %v684_v40 = vmul.f32 %v2684_v13, %v672_v34 }
 0x1eb   : > { %v2893_v55 = vsel %vm700_vm6, %v2694_v19, %v697_v41  ;;  %v2898_v53 = vsel %vm700_vm6, %v697_v41, %v2694_v19  ;;  %v597_v17 = vadd.f32 %v593_v51, %v551_v58  ;;  %v642_v19 = vadd.f32 %v638_v29, %v596_v8  ;;  %3862 = vst [vmem:[#allocation42_spill] sm:$0xff] %v2913_v12  ;;  %v844_v8 = vld [vmem:[#allocation2 + $0x7] ss:$8 sm:$0x3] }
 0x1ec   : > { %v718_v60 = vmul.f32 %v2871_v49, %v2898_v53  ;;  %v719_v48 = vmul.f32 %v2874_v5, %v2893_v55  ;;  %970 = vrot.lane.b32.xlu1 %v2528_v43, %s3833_s12  ;;  %v685_v41 = vmul.f32 %v2684_v13, %v673_v24  ;;  %v2926_v29 = vrot.slane %v798_v4, %v2768_v14 }
 0x1ed   : > { %v643_v39 = vadd.f32 %v639_v47, %v597_v17  ;;  %v688_v13 = vadd.f32 %v684_v40, %v642_v19 }
 0x1ee   : > { %v730_v1 = vmul.f32 %v2587_v50, %v718_v60  ;;  %v743_v34 = vpop.permute.xlu1 %742  ;;  %3863 = vst [vmem:[#allocation43_spill] sm:$0xff] %v2926_v29  ;;  %v731_v24 = vmul.f32 %v2587_v50, %v719_v48  ;;  %v2938_v50 = vpop.permute.xlu0 %648 }
 0x1ef   : > { %v2918_v15 = vsel %vm746_vm7, %v2698_v20, %v743_v34  ;;  %v2923_v58 = vsel %vm746_vm7, %v743_v34, %v2698_v20  ;;  %v689_v20 = vadd.f32 %v685_v41, %v643_v39  ;;  %v2951_v41 = vrot.slane %v844_v8, %v2764_v0 }
 0x1f0   : > { %v764_v51 = vmul.f32 %v2881_v56, %v2923_v58  ;;  %v765_v47 = vmul.f32 %v2887_v7, %v2918_v15  ;;  %974 = vrot.lane.b32.xlu1 %v2538_v45, %s3833_s12  ;;  %v734_v60 = vadd.f32 %v730_v1, %v688_v13  ;;  %v2954_v1 = vrot.slane %v844_v8, %v2768_v14 }
 0x1f1   : > { %3864 = vst [vmem:[#allocation44_spill] sm:$0xff] %v2951_v41 }
 0x1f2   : > { %v776_v4 = vmul.f32 %v2700_v21, %v764_v51  ;;  %v777_v40 = vmul.f32 %v2700_v21, %v765_v47  ;;  %v789_v17 = vpop.permute.xlu1 %788  ;;  %3865 = vst [vmem:[#allocation45_spill] sm:$0xff] %v2954_v1  ;;  %v735_v21 = vadd.f32 %v731_v24, %v689_v20  ;;  %v890_v51 = vld [vmem:[#allocation2 + $0x10] ss:$8 sm:$0x3] }
 0x1f3   : > { %v2943_v48 = vsel %vm792_vm8, %v2704_v22, %v789_v17  ;;  %v2948_v19 = vsel %vm792_vm8, %v789_v17, %v2704_v22  ;;  %v2976_v20 = vrot.slane %v890_v51, %v2764_v0 }
 0x1f4   : > { %v780_v34 = vadd.f32 %v776_v4, %v734_v60  ;;  %v810_v39 = vmul.f32 %v2913_v12, %v2948_v19  ;;  %v811_v13 = vmul.f32 %v2926_v29, %v2943_v48  ;;  %1016 = vrot.lane.b32.xlu1 %v2528_v43, %s3835_s29  ;;  %v781_v22 = vadd.f32 %v777_v40, %v735_v21 }
 0x1f5   : > { %3866 = vst [vmem:[#allocation46_spill] sm:$0xff] %v2976_v20  ;;  %v2979_v60 = vrot.slane %v890_v51, %v2768_v14 }
 0x1f6   : > { %v822_v47 = vmul.f32 %v2716_v27, %v810_v39  ;;  %v823_v17 = vmul.f32 %v2716_v27, %v811_v13  ;;  %v835_v7 = vpop.permute.xlu1 %834  ;;  %v936_v39 = vld [vmem:[#allocation2 + $0x11] ss:$8 sm:$0x3] }
 0x1f7   : > { %v2968_v24 = vsel %vm838_vm9, %v2710_v25, %v835_v7  ;;  %v2973_v8 = vsel %vm838_vm9, %v835_v7, %v2710_v25  ;;  %3867 = vst [vmem:[#allocation47_spill] sm:$0xff] %v2979_v60  ;;  %v2987_v25 = vpop.permute.xlu0 %513 }
 0x1f8   : > { %v826_v27 = vadd.f32 %v822_v47, %v780_v34  ;;  %v827_v4 = vadd.f32 %v823_v17, %v781_v22  ;;  %v856_v40 = vmul.f32 %v2951_v41, %v2973_v8  ;;  %v857_v21 = vmul.f32 %v2954_v1, %v2968_v24  ;;  %1020 = vrot.lane.b32.xlu1 %v2538_v45, %s3835_s29  ;;  %v982_v41 = vld [vmem:[#allocation2 + $0x12] ss:$8 sm:$0x3]  ;;  %s1952_s29 = sshll.u32 %s2373_s21, 7  ;;  %s3623_s21 = scalar_lea.hbm %s3699_s11, %s1953_s25 }
 0x1f9   : > { %v3003_v47 = vrot.slane %v936_v39, %v2764_v0  ;;  %v3006_v17 = vrot.slane %v936_v39, %v2768_v14 }
 0x1fa   : > { %v868_v7 = vmul.f32 %v2732_v32, %v856_v40  ;;  %v869_v13 = vmul.f32 %v2732_v32, %v857_v21  ;;  %v881_v51 = vpop.permute.xlu1 %880 }
 0x1fb   : > { %v2995_v34 = vsel %vm884_vm10, %v2714_v26, %v881_v51  ;;  %v3000_v22 = vsel %vm884_vm10, %v881_v51, %v2714_v26  ;;  %v3017_v39 = vpop.permute.xlu0 %606 }
 0x1fc   : > { %v872_v32 = vadd.f32 %v868_v7, %v826_v27  ;;  %v873_v40 = vadd.f32 %v869_v13, %v827_v4  ;;  %v902_v21 = vmul.f32 %v2976_v20, %v3000_v22  ;;  %v903_v1 = vmul.f32 %v2979_v60, %v2995_v34  ;;  %1062 = vrot.lane.b32.xlu1 %v2528_v43, %s3836_s26  ;;  %v1028_v20 = vld [vmem:[#allocation2 + $0x13] ss:$8 sm:$0x3] }
 0x1fd   : > { %v3026_v7 = vrot.slane %v982_v41, %v2764_v0  ;;  %v3029_v13 = vrot.slane %v982_v41, %v2768_v14 }
 0x1fe   : > { %v914_v26 = vmul.f32 %v2748_v37, %v902_v21  ;;  %v915_v51 = vmul.f32 %v2748_v37, %v903_v1  ;;  %v927_v29 = vpop.permute.xlu1 %926 }
 0x1ff   : > { %v931_v27 = vsel %vm930_vm11, %v2720_v28, %v927_v29  ;;  %v933_v4 = vsel %vm930_vm11, %v927_v29, %v2720_v28  ;;  %3868 = vst [vmem:[#allocation48_spill] sm:$0xff] %v3029_v13  ;;  %v3038_v56 = vpop.permute.xlu0 %1003 }
 0x200   : > { %v918_v37 = vadd.f32 %v914_v26, %v872_v32  ;;  %v919_v1 = vadd.f32 %v915_v51, %v873_v40  ;;  %v948_v21 = vmul.f32 %v3003_v47, %v933_v4  ;;  %v949_v60 = vmul.f32 %v3006_v17, %v931_v27  ;;  %1066 = vrot.lane.b32.xlu1 %v2538_v45, %s3836_s26  ;;  %v1074_v4 = vld [vmem:[#allocation2 + $0x14] ss:$8 sm:$0x3] }
 0x201   : > { %3869 = vst [vmem:[#allocation49_spill] sm:$0xff] %v3038_v56  ;;  %v3047_v40 = vrot.slane %v1028_v20, %v2764_v0  ;;  %v3050_v26 = vrot.slane %v1028_v20, %v2768_v14 }
 0x202   : > { %v960_v12 = vmul.f32 %v2766_v18, %v948_v21  ;;  %v961_v28 = vmul.f32 %v2766_v18, %v949_v60  ;;  %v973_v29 = vpop.permute.xlu1 %972 }
 0x203   : > { %v977_v41 = vsel %vm976_vm12, %v2726_v30, %v973_v29  ;;  %v979_v32 = vsel %vm976_vm12, %v973_v29, %v2726_v30  ;;  %3870 = vst [vmem:[#allocation50_spill] sm:$0xff] %v3047_v40  ;;  %3871 = vst [vmem:[#allocation51_spill] sm:$0xff] %v3050_v26 }
 0x204   : > { %v964_v18 = vadd.f32 %v960_v12, %v918_v37  ;;  %v965_v60 = vadd.f32 %v961_v28, %v919_v1  ;;  %v994_v51 = vmul.f32 %v3026_v7, %v979_v32  ;;  %v995_v27 = vmul.f32 %v3029_v13, %v977_v41  ;;  %1108 = vrot.lane.b32.xlu1 %v2528_v43, %s3838_s24 }
 0x205   : > { %v3066_v37 = vrot.slane %v1074_v4, %v2764_v0  ;;  %v3069_v1 = vrot.slane %v1074_v4, %v2768_v14 }
 0x206   : > { %v1006_v21 = vmul.f32 %v2850_v2, %v994_v51  ;;  %v1007_v30 = vmul.f32 %v2850_v2, %v995_v27  ;;  %v1019_v29 = vpop.permute.xlu1 %1018  ;;  %v1120_v51 = vld [vmem:[#allocation2 + $0x16] ss:$8 sm:$0x3]  ;;  %v1046_v27 = vpop.permute.xlu0 %1045 }
 0x207   : > { %v1023_v12 = vsel %vm1022_vm13, %v2730_v31, %v1019_v29  ;;  %v1025_v20 = vsel %vm1022_vm13, %v1019_v29, %v2730_v31  ;;  %3872 = vst [vmem:[#allocation52_spill] sm:$0xff] %v3066_v37  ;;  %3873 = vst [vmem:[#allocation53_spill] sm:$0xff] %v3069_v1 }
 0x208   : > { %v1010_v28 = vadd.f32 %v1006_v21, %v964_v18  ;;  %v1011_v41 = vadd.f32 %v1007_v30, %v965_v60  ;;  %v1040_v2 = vmul.f32 %v3047_v40, %v1025_v20  ;;  %v1041_v32 = vmul.f32 %v3050_v26, %v1023_v12  ;;  %1112 = vrot.lane.b32.xlu1 %v2538_v45, %s3838_s24  ;;  %s3607_s24 = sand.u32 1, %s2233_s18  }
 0x209   : > { %v3083_v60 = vrot.slane %v1120_v51, %v2764_v0  ;;  %v3086_v21 = vrot.slane %v1120_v51, %v2768_v14  ;;  %s1931_s26 = sshll.u32 %s3607_s24, 3  ;;  %s1932_s12 = sshll.u32 %s3607_s24, 2 }
 0x20a   : > { %v1052_v56 = vmul.f32 %v1046_v27, %v1040_v2  ;;  %v1053_v13 = vmul.f32 %v1046_v27, %v1041_v32  ;;  %v1065_v31 = vpop.permute.xlu1 %1064  ;;  %v1166_v2 = vld [vmem:[#allocation2 + $0x17] ss:$8 sm:$0x3]  ;;  %s398_s13 = scalar_lea.vmem [#allocation5], %s1931_s26  ;;  %s405_s30 = scalar_lea.vmem [#allocation6], %s1932_s12 }
 0x20b   : > { %v1069_v4 = vsel %vm1068_vm14, %v2736_v33, %v1065_v31  ;;  %v1071_v18 = vsel %vm1068_vm14, %v1065_v31, %v2736_v33  ;;  %3874 = vst [vmem:[#allocation54_spill] sm:$0xff] %v3083_v60  ;;  %3875 = vst [vmem:[#allocation55_spill] sm:$0xff] %v3086_v21  ;;  %v1291_v31 = vld [vmem:[#allocation2 + $0x22] ss:$8 sm:$0x3]  ;;  %s1808_s16 = sshll.u32 %s398_s13, 4  ;;  %s3618_s16 = int_to_ptr.vmem [resolvable:$true] %s1808_s16 }
 0x20c   : > { %v1056_v30 = vadd.f32 %v1052_v56, %v1010_v28  ;;  %v1057_v29 = vadd.f32 %v1053_v13, %v1011_v41  ;;  %v1086_v12 = vmul.f32 %v3066_v37, %v1071_v18  ;;  %v1087_v20 = vmul.f32 %v3069_v1, %v1069_v4  ;;  %1154 = vrot.lane.b32.xlu1 %v2528_v43, %s3876_s0  ;;  %v1258_v1 = vld [vmem:[#allocation2 + $0x21] ss:$8 sm:$0x3]  ;;  %s1822_s22 = sshll.u32 %s405_s30, 4  ;;  %s1789_s12 = scalar_lea.sflag [#allocation4], %s3607_s24  ;;  %s3625_s22 = int_to_ptr.vmem [resolvable:$true] %s1822_s22 }
 0x20d   : > { %v3102_v28 = vrot.slane %v1166_v2, %v2764_v0  ;;  %v3105_v41 = vrot.slane %v1166_v2, %v2768_v14  ;;  %v1324_v2 = vld [vmem:[#allocation2 + $0x23] ss:$8 sm:$0x3]  ;;  %v3142_v37 = vrot.slane %v1291_v31, %v2768_v14 }
 0x20e   : > { %v1098_v32 = vmul.f32 %v2595_v52, %v1086_v12  ;;  %v1099_v33 = vmul.f32 %v2595_v52, %v1087_v20  ;;  %v1111_v27 = vpop.permute.xlu1 %1110  ;;  %v1212_v12 = vld [vmem:[#allocation2 + $0x20] ss:$8 sm:$0x3]  ;;  %v3113_v20 = vmul.f32 %v2662_v6, %v2528_v43 }
 0x20f   : > { %v1115_v56 = vsel %vm1114_vm15, %v2742_v35, %v1111_v27  ;;  %v1117_v13 = vsel %vm1114_vm15, %v1111_v27, %v2742_v35  ;;  %3877 = vst [vmem:[#allocation56_spill] sm:$0xff] %v3102_v28  ;;  %3878 = vst [vmem:[#allocation57_spill] sm:$0xff] %v3105_v41  ;;  %v3117_v35 = vmul.f32 %v2662_v6, %v2538_v45 }
 0x210   : > { %v1102_v51 = vadd.f32 %v1098_v32, %v1056_v30  ;;  %v1103_v52 = vadd.f32 %v1099_v33, %v1057_v29  ;;  %v1132_v4 = vmul.f32 %v3083_v60, %v1115_v56  ;;  %v1133_v18 = vmul.f32 %v3086_v21, %v1117_v13  ;;  %1158 = vrot.lane.b32.xlu1 %v2538_v45, %s3876_s0  ;;  %v1357_v29 = vld [vmem:[#allocation2 + $0x24] ss:$8 sm:$0x3]  ;;  %s2143_s0 = scalar_lea.vmem %s3618_s16, 128 }
 0x211   : > { %v3120_v30 = vrot.slane %v1291_v31, %v2764_v0  ;;  %v3132_v13 = vrot.slane %v1212_v12, %v2764_v0  ;;  %v3135_v21 = vrot.slane %v1212_v12, %v2768_v14  ;;  %3882 = vst [vmem:[#allocation60_spill] sm:$0xff] %v3142_v37  ;;  %v3154_v12 = vrot.slane %v1357_v29, %v2768_v14  ;;  %p2144_p6 = scmp.ne.s32.totalorder %s3618_s16, %s2143_s0 }
 0x212   : > { %v1144_v32 = vmul.f32 %v2605_v54, %v1132_v4  ;;  %v1145_v33 = vmul.f32 %v2605_v54, %v1133_v18  ;;  %v1157_v27 = vpop.permute.xlu1 %1156 }
 0x213   : > { %3879 = vst [vmem:[#allocation58_spill] sm:$0xff] %v3120_v30  ;;  %v1161_v56 = vsel %vm3778_vm0, %v2746_v36, %v1157_v27  ;;  %v1163_v6 = vsel %vm3778_vm0, %v1157_v27, %v2746_v36  ;;  %3880 = vst [vmem:[#allocation59_spill] sm:$0xff] %v3135_v21  ;;  %v3145_v36 = vrot.slane %v1324_v2, %v2764_v0  ;;  %vm1252_vm0 = vcmp.lt.s32.totalorder %v2762_v46, 119  ;;  %p2145_p10 = pnand %p2144_p6, %p3980_p9 }
 0x214   : > { %v1148_v4 = vadd.f32 %v1144_v32, %v1102_v51  ;;  %v1149_v60 = vadd.f32 %v1145_v33, %v1103_v52  ;;  %v1178_v54 = vmul.f32 %v3102_v28, %v1161_v56  ;;  %v1179_v18 = vmul.f32 %v3105_v41, %v1163_v6  ;;  %1200 = vrot.lane.b32.xlu1 %v2528_v43, %s3881_s14  ;;  %v1390_v52 = vld [vmem:[#allocation2 + $0x25] ss:$8 sm:$0x3]  ;;  %v1423_v32 = vld [vmem:[#allocation2 + $0x26] ss:$8 sm:$0x3] }
 0x215   : > { %v3148_v27 = vrot.slane %v1324_v2, %v2768_v14  ;;  %v3151_v51 = vrot.slane %v1357_v29, %v2764_v0  ;;  %3885 = vst [vmem:[#allocation63_spill] sm:$0xff] %v3154_v12  ;;  %v3166_v41 = vrot.slane %v1258_v1, %v2764_v0  ;;  %v3169_v29 = vrot.slane %v1258_v1, %v2768_v14  ;;  %p2146_p12 = pneg %p2145_p10 }
 0x216   : > { %v1190_v33 = vmul.f32 %v2617_v57, %v1178_v54  ;;  %v1191_v56 = vmul.f32 %v2617_v57, %v1179_v18  ;;  %v1203_v31 = vpop.permute.xlu1 %1202  ;;  %v1456_v54 = vld [vmem:[#allocation2 + $0x27] ss:$8 sm:$0x3]  ;;  %v3176_v40 = vrot.slane %v1390_v52, %v2764_v0  ;;  %v3185_v1 = vrot.slane %v1423_v32, %v2768_v14 }
 0x217   : > { %3883 = vst [vmem:[#allocation61_spill] sm:$0xff] %v3148_v27  ;;  %3884 = vst [vmem:[#allocation62_spill] sm:$0xff] %v3151_v51  ;;  %v1207_v2 = vsel %vm1206_vm1, %v2752_v38, %v1203_v31  ;;  %v1209_v6 = vsel %vm1206_vm1, %v1203_v31, %v2752_v38  ;;  %v3179_v38 = vrot.slane %v1390_v52, %v2768_v14 }
 0x218   : > { %v1194_v28 = vadd.f32 %v1190_v33, %v1148_v4  ;;  %v1195_v57 = vadd.f32 %v1191_v56, %v1149_v60  ;;  %v1224_v18 = vmul.f32 %v3132_v13, %v1207_v2  ;;  %v1225_v26 = vmul.f32 %v3135_v21, %v1209_v6  ;;  %1204 = vrot.lane.b32.xlu1 %v2538_v45, %s3881_s14  ;;  %v1489_v33 = vld [vmem:[#allocation2 + $0x30] ss:$8 sm:$0x3] }
 0x219   : > { %v3182_v31 = vrot.slane %v1423_v32, %v2764_v0  ;;  %v1303_v60 = vmul.f32 %v3120_v30, %v2788_v23  ;;  %v1304_v4 = vmul.f32 %v3142_v37, %v2783_v44  ;;  %v3194_v52 = vrot.slane %v1456_v54, %v2764_v0 }
 0x21a   : > { %v1236_v56 = vmul.f32 %v2628_v59, %v1224_v18  ;;  %v1237_v2 = vmul.f32 %v2628_v59, %v1225_v26  ;;  %v1249_v6 = vpop.permute.xlu1 %1248  ;;  %v3197_v21 = vrot.slane %v1456_v54, %v2768_v14  ;;  %v1336_v26 = vmul.f32 %v3145_v36, %v2811_v10 }
 0x21b   : > { %v1253_v32 = vsel %vm1252_vm0, %v2758_v42, %v1249_v6  ;;  %v1255_v23 = vsel %vm1252_vm0, %v1249_v6, %v2758_v42  ;;  %v1337_v54 = vmul.f32 %v3148_v27, %v2804_v3  ;;  %v3214_v30 = vrot.slane %v1489_v33, %v2764_v0  ;;  %v3890_v6 = vld [vmem:[#allocation37_spill] sm:$0xff] }
 0x21c   : > { %3886 = vst [vmem:[#allocation64_spill] sm:$0xff] %v3197_v21  ;;  %v1240_v44 = vadd.f32 %v1236_v56, %v1194_v28  ;;  %v1241_v37 = vadd.f32 %v1237_v2, %v1195_v57  ;;  %v1270_v18 = vmul.f32 %v3166_v41, %v1253_v32  ;;  %v1271_v59 = vmul.f32 %v3169_v29, %v1255_v23 }
 0x21d   : > { %1246 = vrot.lane.b32.xlu1 %v2528_v43, %s3887_s15  ;;  %3888 = vst [vmem:[#allocation65_spill] sm:$0xff] %v3214_v30  ;;  %v3217_v42 = vrot.slane %v1489_v33, %v2768_v14  ;;  %v1315_v28 = vmul.f32 %v2642_v63, %v1303_v60  ;;  %v1316_v57 = vmul.f32 %v2642_v63, %v1304_v4 }
 0x21e   : > { %v1282_v56 = vmul.f32 %v2634_v61, %v1270_v18  ;;  %v1283_v43 = vmul.f32 %v2634_v61, %v1271_v59  ;;  %v510_v2 = vpop.permute.xlu1 %509  ;;  %v1369_v10 = vmul.f32 %v3151_v51, %v2831_v11  ;;  %v1370_v3 = vmul.f32 %v3154_v12, %v3890_v6  ;;  %v3891_v61 = vld [vmem:[#allocation30_spill] sm:$0xff]  ;;  %v3892_v11 = vld [vmem:[#allocation31_spill] sm:$0xff] }
 0x21f   : > { %3889 = vst [vmem:[#allocation66_spill] sm:$0xff] %v3217_v42  ;;  %v3230_v33 = vsel %vm517_vm2, %v510_v2, %v2987_v25  ;;  %v3235_v63 = vsel %vm517_vm2, %v2987_v25, %v510_v2  ;;  %v3893_v18 = vld [vmem:[#allocation19_spill] sm:$0xff]  ;;  %v1402_v12 = vmul.f32 %v3176_v40, %v2858_v9  ;;  %v3895_v2 = vld [vmem:[#allocation16_spill] sm:$0xff]  ;;  %v1436_v9 = vmul.f32 %v3185_v1, %v2898_v53 }
 0x220   : > { %v1286_v60 = vadd.f32 %v1282_v56, %v1240_v44  ;;  %v1287_v4 = vadd.f32 %v1283_v43, %v1241_v37  ;;  %v536_v32 = vmul.f32 %v3891_v61, %v3235_v63  ;;  %v537_v23 = vmul.f32 %v3892_v11, %v3230_v33  ;;  %v3894_v25 = vld [vmem:[#allocation39_spill] sm:$0xff] }
 0x221   : > { %1250 = vrot.lane.b32.xlu1 %v2538_v45, %s3887_s15  ;;  %v1348_v59 = vmul.f32 %v3893_v18, %v1336_v26  ;;  %v1349_v6 = vmul.f32 %v3893_v18, %v1337_v54  ;;  %v1403_v44 = vmul.f32 %v3179_v38, %v3894_v25  ;;  %v1522_v37 = vld [vmem:[#allocation2 + $0x31] ss:$8 sm:$0x3]  ;;  %v1435_v54 = vmul.f32 %v3182_v31, %v2893_v55  ;;  %v1555_v18 = vld [vmem:[#allocation2 + $0x32] ss:$8 sm:$0x3]  ;;  %s3616_s15 = scalar_lea.hbm %s3698_s10, %s1952_s29 }
 0x222   : > { %v1319_v56 = vadd.f32 %v1315_v28, %v1286_v60  ;;  %v1320_v43 = vadd.f32 %v1316_v57, %v1287_v4  ;;  %v548_v61 = vmul.f32 %v3895_v2, %v536_v32  ;;  %v549_v11 = vmul.f32 %v3895_v2, %v537_v23  ;;  %v3251_v51 = vpop.permute.xlu1 %602  ;;  %v3896_v45 = vld [vmem:[#allocation12_spill] sm:$0xff]  ;;  %v3899_v4 = vld [vmem:[#allocation13_spill] sm:$0xff]  ;;  %s2290_s29 = smov [#allocation5]  }
 0x223   : > { %v1381_v27 = vmul.f32 %v3896_v45, %v1369_v10  ;;  %v1382_v26 = vmul.f32 %v3896_v45, %v1370_v3  ;;  %v2114_v10 = vld [vmem:[%s3692_s4 + $0x8] sm:$0xff]  ;;  %v1468_v55 = vmul.f32 %v3194_v52, %v2918_v15  ;;  %v1469_v53 = vmul.f32 %v3197_v21, %v2923_v58  ;;  %s2147_s14 = sshll.u32 %s2290_s29, 4  ;;  %s2148_s14 = int_to_ptr.vmem [resolvable:$false] %s2147_s14 }
 0x224   : > { %v1352_v25 = vadd.f32 %v1348_v59, %v1319_v56  ;;  %v1353_v28 = vadd.f32 %v1349_v6, %v1320_v43  ;;  %v3260_v57 = vadd.f32 %v548_v61, %v3113_v20  ;;  %v3263_v60 = vadd.f32 %v549_v11, %v3117_v35  ;;  %v3902_v43 = vld [vmem:[#allocation21_spill] sm:$0xff]  ;;  %v3904_v11 = vld [vmem:[#allocation14_spill] sm:$0xff]  ;;  %s2149_s2 = scalar_lea.vmem %s2148_s14, 256  ;;  %p2150_p2 = scmp.lt.s32.totalorder %s3618_s16, %s2148_s14 }
 0x225   : > { %1378 = vperm.xlu1 %2095, %v2114_v10   ;;  %v3273_v3 = vrot.slane %v1522_v37, %v2764_v0  ;;  %v3276_v20 = vrot.slane %v1522_v37, %v2768_v14  ;;  %v1414_v35 = vmul.f32 %v3899_v4, %v1402_v12  ;;  %v1415_v32 = vmul.f32 %v3899_v4, %v1403_v44  ;;  %p2151_p3 = scmp.lt.s32.totalorder %s2149_s2, %s2143_s0 }
 0x226   : > { %v1385_v23 = vadd.f32 %v1381_v27, %v1352_v25  ;;  %v1386_v59 = vadd.f32 %v1382_v26, %v1353_v28  ;;  %v3280_v6 = vpop.permute.xlu1 %694  ;;  %v1501_v15 = vmul.f32 %v3214_v30, %v2943_v48  ;;  %v1502_v58 = vmul.f32 %v3217_v42, %v2948_v19 }
 0x227   : > { %3897 = vst [vmem:[#allocation37_spill] sm:$0xff] %v3273_v3  ;;  %3898 = vst [vmem:[#allocation30_spill] sm:$0xff] %v3276_v20  ;;  %v3287_v56 = vrot.slane %v1555_v18, %v2764_v0  ;;  %v3290_v37 = vrot.slane %v1555_v18, %v2768_v14  ;;  %v1447_v12 = vmul.f32 %v3902_v43, %v1435_v54  ;;  %v3903_v61 = vmov 21   ;;  %p2152_p4 = por %p2151_p3, %p2150_p2 }
 0x228   : > { %v1448_v44 = vmul.f32 %v3902_v43, %v1436_v9  ;;  %v1418_v27 = vadd.f32 %v1414_v35, %v1385_v23  ;;  %v1419_v2 = vadd.f32 %v1415_v32, %v1386_v59  ;;  %v1480_v45 = vmul.f32 %v3904_v11, %v1468_v55  ;;  %v3905_v9 = vld [vmem:[#allocation15_spill] sm:$0xff]  ;;  %v3907_v35 = vld [vmem:[#allocation17_spill] sm:$0xff] }
 0x229   : > { %3900 = vst [vmem:[#allocation31_spill] sm:$0xff] %v3287_v56  ;;  %3901 = vst [vmem:[#allocation19_spill] sm:$0xff] %v3290_v37  ;;  %2096 = vset.pattern.permute.xlu1 %v3903_v61  ;;  %v1481_v48 = vmul.f32 %v3904_v11, %v1469_v53  ;;  %v1534_v0 = vmul.f32 %v3273_v3, %v2968_v24  ;;  %v1535_v14 = vmul.f32 %v3276_v20, %v2973_v8  ;;  %v3906_v24 = vmov 23   ;;  %v3947_v3 = vld [vmem:[#allocation51_spill] sm:$0xff]  ;;  %p2153_p7 = pnand %p2152_p4, %p2146_p12 }
 0x22a   : > { %1411 = vperm.xlu1 %2096, %v2114_v10   ;;  %v1451_v19 = vadd.f32 %v1447_v12, %v1418_v27  ;;  %v1452_v26 = vadd.f32 %v1448_v44, %v1419_v2  ;;  %v3301_v54 = vpop.permute.xlu1 %740  ;;  %v1513_v18 = vmul.f32 %v3905_v9, %v1501_v15  ;;  %v1514_v25 = vmul.f32 %v3905_v9, %v1502_v58  ;;  %v3908_v58 = vld [vmem:[#allocation18_spill] sm:$0xff] }
 0x22b   : > { %v1567_v28 = vmul.f32 %v3287_v56, %v2995_v34  ;;  %v1568_v55 = vmul.f32 %v3290_v37, %v3000_v22  ;;  %v1546_v8 = vmul.f32 %v3907_v35, %v1534_v0  ;;  %v1547_v32 = vmul.f32 %v3907_v35, %v1535_v14 }
 0x22c   : > { %v1485_v53 = vadd.f32 %v1481_v48, %v1452_v26  ;;  %v1484_v4 = vadd.f32 %v1480_v45, %v1451_v19  ;;  %v3909_v22 = vmov 24   ;;  %v3910_v45 = vmov 26   ;;  %v1588_v19 = vld [vmem:[%s3693_s5 + $0x8] sm:$0xff]  ;;  %v3911_v26 = vld [vmem:[#allocation35_spill] sm:$0xff] }
 0x22d   : > { %v1579_v43 = vmul.f32 %v3908_v58, %v1567_v28  ;;  %v1580_v34 = vmul.f32 %v3908_v58, %v1568_v55  ;;  %v3330_v48 = vsel %vm608_vm4, %v3251_v51, %v3017_v39  ;;  %v3336_v0 = vsel %vm608_vm4, %v3017_v39, %v3251_v51  ;;  %v3913_v51 = vld [vmem:[#allocation32_spill] sm:$0xff]  ;;  %v3914_v55 = vld [vmem:[#allocation34_spill] sm:$0xff] }
 0x22e   : > { %2098 = vset.pattern.permute.xlu1 %v3906_v24  ;;  %v3312_v23 = vpop.permute.xlu1 %786  ;;  %v1518_v59 = vadd.f32 %v1514_v25, %v1485_v53  ;;  %v1517_v15 = vadd.f32 %v1513_v18, %v1484_v4  ;;  %v628_v9 = vmul.f32 %v3911_v26, %v3336_v0  ;;  %v3912_v18 = vld [vmem:[#allocation36_spill] sm:$0xff]  ;;  %v3915_v4 = vmov 0  }
 0x22f   : > { %1477 = vperm.xlu1 %2098, %v2114_v10   ;;  %v629_v25 = vmul.f32 %v3912_v18, %v3330_v48  ;;  %v3916_v24 = vld [vmem:[#allocation24_spill] sm:$0xff]  ;;  %vm3951_vm2 = vcmp.lt.s32.totalorder %v2762_v46, 121 }
 0x230   : > { %v1551_v12 = vadd.f32 %v1547_v32, %v1518_v59  ;;  %v1550_v44 = vadd.f32 %v1546_v8, %v1517_v15  ;;  %v1726_v59 = vld [vmem:[%s3697_s9] sm:$0x3] }
 0x232   : > { %v3317_v27 = vpop.permute.xlu1 %832  ;;  %v3319_v2 = vadd.f32 %v1580_v34, %v1551_v12  ;;  %v3321_v61 = vadd.f32 %v1579_v43, %v1550_v44 }
 0x233   : > { %2099 = vset.pattern.permute.xlu1 %v3909_v22  ;;  %v3918_v22 = vld [vmem:[#allocation38_spill] sm:$0xff] }
 0x234   : > { %1510 = vperm.xlu1 %2099, %v2114_v10  }
 0x236   : > { %v3323_v11 = vpop.permute.xlu1 %878 }
 0x238   : > { %2101 = vset.pattern.permute.xlu1 %v3910_v45 }
 0x239   : > { %1576 = vperm.xlu1 %2101, %v2114_v10  }
 0x23a   : > { %v561_v14 = vpop.permute.xlu1 %560 }
 0x23b   : > { %v3348_v28 = vsel %vm562_vm3, %v2907_v62, %v561_v14  ;;  %v3353_v39 = vsel %vm562_vm3, %v561_v14, %v2907_v62  ;;  %v3917_v62 = vld [vmem:[#allocation20_spill] sm:$0xff]  ;;  %vm3952_vm3 = vmmov %vm3951_vm2 }
 0x23c   : > { %v582_v10 = vmul.f32 %v3913_v51, %v3353_v39  ;;  %v583_v53 = vmul.f32 %v3914_v55, %v3348_v28  ;;  %v640_v15 = vmul.f32 %v3917_v62, %v628_v9  ;;  %v641_v58 = vmul.f32 %v3917_v62, %v629_v25  ;;  %v3919_v9 = vld [vmem:[#allocation25_spill] sm:$0xff] }
 0x23d   : > { %2102 = vset.pattern.permute.xlu1 %v3915_v4 }
 0x23e   : > { %1596 = vperm.xlu1 %2102, %v1588_v19   ;;  %v594_v35 = vmul.f32 %v3916_v24, %v582_v10  ;;  %v595_v8 = vmul.f32 %v3916_v24, %v583_v53  ;;  %v653_v32 = vpop.permute.xlu1 %652  ;;  %v3920_v53 = vld [vmem:[#allocation23_spill] sm:$0xff] }
 0x23f   : > { %v3370_v43 = vsel %vm654_vm5, %v2938_v50, %v653_v32  ;;  %v3375_v34 = vsel %vm654_vm5, %v653_v32, %v2938_v50 }
 0x240   : > { %v598_v12 = vadd.f32 %v594_v35, %v3260_v57  ;;  %v599_v44 = vadd.f32 %v595_v8, %v3263_v60  ;;  %v674_v45 = vmul.f32 %v3918_v22, %v3375_v34  ;;  %v675_v14 = vmul.f32 %v2847_v16, %v3370_v43 }
 0x242   : > { %1729 = vperm.xlu1 %2102, %v1726_v59   ;;  %v644_v19 = vadd.f32 %v640_v15, %v598_v12  ;;  %v645_v26 = vadd.f32 %v641_v58, %v599_v44  ;;  %v686_v18 = vmul.f32 %v3919_v9, %v674_v45  ;;  %v687_v25 = vmul.f32 %v3919_v9, %v675_v14  ;;  %v699_v51 = vpop.permute.xlu1 %698  ;;  %v3921_v59 = vld [vmem:[#allocation40_spill] sm:$0xff]  ;;  %v3922_v15 = vld [vmem:[#allocation41_spill] sm:$0xff]  ;;  %v3923_v12 = vld [vmem:[#allocation26_spill] sm:$0xff] }
 0x243   : > { %v3388_v50 = vsel %vm700_vm6, %v3280_v6, %v699_v51  ;;  %v3393_v57 = vsel %vm700_vm6, %v699_v51, %v3280_v6  ;;  %v3926_v9 = vld [vmem:[#allocation42_spill] sm:$0xff]  ;;  %vm1672_vm6 = vcmask 1043456  }
 0x244   : > { %v720_v16 = vmul.f32 %v2871_v49, %v3393_v57  ;;  %v721_v60 = vmul.f32 %v2874_v5, %v3388_v50  ;;  %v690_v10 = vadd.f32 %v686_v18, %v644_v19  ;;  %v691_v55 = vadd.f32 %v687_v25, %v645_v26  ;;  %v1662_v49 = vld [vmem:[%s3695_s7] sm:$0xf]  ;;  %v3927_v25 = vld [vmem:[#allocation43_spill] sm:$0xff] }
 0x245   : > { %1665 = vperm.xlu0 %2103, %v1662_v49  }
 0x246   : > { %v732_v4 = vmul.f32 %v3920_v53, %v720_v16  ;;  %v733_v24 = vmul.f32 %v3920_v53, %v721_v60  ;;  %v745_v35 = vpop.permute.xlu1 %744  ;;  %v3928_v16 = vld [vmem:[#allocation27_spill] sm:$0xff] }
 0x247   : > { %v3404_v8 = vsel %vm746_vm7, %v3301_v54, %v745_v35  ;;  %v3409_v6 = vsel %vm746_vm7, %v745_v35, %v3301_v54  ;;  %v3931_v35 = vld [vmem:[#allocation44_spill] sm:$0xff]  ;;  %vm1668_vm7 = vcmask 64512  }
 0x248   : > { %v736_v5 = vadd.f32 %v732_v4, %v690_v10  ;;  %v737_v32 = vadd.f32 %v733_v24, %v691_v55  ;;  %v766_v62 = vmul.f32 %v3921_v59, %v3409_v6  ;;  %v767_v58 = vmul.f32 %v3922_v15, %v3404_v8  ;;  %v3933_v59 = vld [vmem:[#allocation28_spill] sm:$0xff] }
 0x24a   : > { %v778_v44 = vmul.f32 %v3923_v12, %v766_v62  ;;  %v779_v22 = vmul.f32 %v3923_v12, %v767_v58  ;;  %v791_v45 = vpop.permute.xlu1 %790 }
 0x24b   : > { %v3423_v54 = vsel %vm792_vm8, %v3312_v23, %v791_v45  ;;  %v3428_v14 = vsel %vm792_vm8, %v791_v45, %v3312_v23  ;;  %v3936_v45 = vld [vmem:[#allocation46_spill] sm:$0xff] }
 0x24c   : > { %3924 = vst [vmem:[#allocation39_spill] sm:$0xff] %v3423_v54  ;;  %3925 = vst [vmem:[#allocation16_spill] sm:$0xff] %v3428_v14  ;;  %v782_v19 = vadd.f32 %v778_v44, %v736_v5  ;;  %v783_v26 = vadd.f32 %v779_v22, %v737_v32  ;;  %v812_v18 = vmul.f32 %v3926_v9, %v3428_v14  ;;  %v3932_v5 = vld [vmem:[#allocation45_spill] sm:$0xff] }
 0x24d   : > { %v813_v51 = vmul.f32 %v3927_v25, %v3423_v54  ;;  %v3954_v54 = vld [vmem:[#allocation55_spill] sm:$0xff] }
 0x24e   : > { %v824_v60 = vmul.f32 %v3928_v16, %v812_v18  ;;  %v837_v55 = vpop.permute.xlu1 %836  ;;  %v3938_v18 = vld [vmem:[#allocation29_spill] sm:$0xff] }
 0x24f   : > { %v825_v10 = vmul.f32 %v3928_v16, %v813_v51  ;;  %v3439_v53 = vsel %vm838_vm9, %v3317_v27, %v837_v55  ;;  %v3444_v23 = vsel %vm838_vm9, %v837_v55, %v3317_v27 }
 0x250   : > { %3929 = vst [vmem:[#allocation12_spill] sm:$0xff] %v3439_v53  ;;  %3930 = vst [vmem:[#allocation13_spill] sm:$0xff] %v3444_v23  ;;  %v828_v4 = vadd.f32 %v824_v60, %v782_v19  ;;  %v858_v49 = vmul.f32 %v3931_v35, %v3444_v23  ;;  %v859_v32 = vmul.f32 %v3932_v5, %v3439_v53 }
 0x251   : > { %v829_v24 = vadd.f32 %v825_v10, %v783_v26  ;;  %v3937_v26 = vld [vmem:[#allocation47_spill] sm:$0xff] }
 0x252   : > { %v870_v62 = vmul.f32 %v3933_v59, %v858_v49  ;;  %v871_v15 = vmul.f32 %v3933_v59, %v859_v32  ;;  %v883_v58 = vpop.permute.xlu1 %882 }
 0x253   : > { %v3455_v12 = vsel %vm884_vm10, %v3323_v11, %v883_v58  ;;  %v3460_v27 = vsel %vm884_vm10, %v883_v58, %v3323_v11  ;;  %v3939_v11 = vld [vmem:[#allocation22_spill] sm:$0xff] }
 0x254   : > { %3934 = vst [vmem:[#allocation21_spill] sm:$0xff] %v3455_v12  ;;  %3935 = vst [vmem:[#allocation14_spill] sm:$0xff] %v3460_v27  ;;  %v874_v44 = vadd.f32 %v870_v62, %v828_v4  ;;  %v875_v22 = vadd.f32 %v871_v15, %v829_v24  ;;  %v904_v19 = vmul.f32 %v3936_v45, %v3460_v27  ;;  %v1050_v45 = vpop.permute.xlu0 %1049 }
 0x255   : > { %v905_v9 = vmul.f32 %v3937_v26, %v3455_v12  ;;  %v3470_v49 = vadd.f32 %v3939_v11, %v3319_v2  ;;  %v3474_v4 = vadd.f32 %v3939_v11, %v3321_v61 }
 0x256   : > { %v916_v25 = vmul.f32 %v3938_v18, %v904_v19  ;;  %v925_v16 = vpop.permute.xlu1 %924 }
 0x257   : > { %v917_v51 = vmul.f32 %v3938_v18, %v905_v9  ;;  %3940 = vst [vmem:[#allocation15_spill] sm:$0xff] %v3470_v49  ;;  %3941 = vst [vmem:[#allocation17_spill] sm:$0xff] %v3474_v4  ;;  %v3477_v5 = vmul.f32 0.70710677, %v3470_v49  ;;  %v3480_v32 = vmul.f32 0.70710677, %v3474_v4 }
 0x258   : > { %v920_v60 = vadd.f32 %v916_v25, %v874_v44  ;;  %v1096_v18 = vpop.permute.xlu0 %1095 }
 0x259   : > { %v921_v10 = vadd.f32 %v917_v51, %v875_v22  ;;  %3942 = vst [vmem:[#allocation18_spill] sm:$0xff] %v3477_v5  ;;  %3943 = vst [vmem:[#allocation35_spill] sm:$0xff] %v3480_v32  ;;  %v3483_v62 = vand.u32 2147483647, %v3477_v5  ;;  %v3486_v15 = vand.u32 2147483647, %v3480_v32 }
 0x25a   : > { %v929_v55 = vpop.permute.xlu1 %928  ;;  %v3945_v5 = vld [vmem:[#allocation33_spill] sm:$0xff] }
 0x25b   : > { %v1610_v58 = vmul.f32 0.3275911, %v3483_v62  ;;  %v1609_v61 = vmul.f32 0.3275911, %v3486_v15  ;;  %v932_v11 = vsel %vm930_vm11, %v925_v16, %v929_v55  ;;  %v934_v4 = vsel %vm930_vm11, %v929_v55, %v925_v16 }
 0x25c   : > { %v1142_v51 = vpop.permute.xlu0 %1141 }
 0x25d   : > { %v1612_v22 = vadd.f32 1.0, %v1610_v58  ;;  %v1611_v19 = vadd.f32 1.0, %v1609_v61  ;;  %v950_v58 = vmul.f32 %v3003_v47, %v934_v4  ;;  %v951_v61 = vmul.f32 %v3006_v17, %v932_v11  ;;  %v3944_v4 = vld [vmem:[#allocation48_spill] sm:$0xff] }
 0x25e   : > { %v971_v35 = vpop.permute.xlu1 %970 }
 0x25f   : > { %2106 = vrcp.f32 %v1612_v22  ;;  %v962_v20 = vmul.f32 %v3945_v5, %v950_v58 }
 0x260   : > { %2108 = vrcp.f32 %v1611_v19  ;;  %v1188_v47 = vpop.permute.xlu0 %1187 }
 0x262   : > { %v975_v24 = vpop.permute.xlu1 %974 }
 0x263   : > { %v978_v22 = vsel %vm976_vm12, %v971_v35, %v975_v24  ;;  %v980_v19 = vsel %vm976_vm12, %v975_v24, %v971_v35  ;;  %v963_v35 = vmul.f32 %v3945_v5, %v951_v61  ;;  %v3946_v24 = vld [vmem:[#allocation50_spill] sm:$0xff]  ;;  %v3949_v61 = vld [vmem:[#allocation52_spill] sm:$0xff] }
 0x264   : > { %v996_v17 = vmul.f32 %v3026_v7, %v980_v19  ;;  %v997_v11 = vmul.f32 %v3944_v4, %v978_v22  ;;  %v3948_v7 = vld [vmem:[#allocation49_spill] sm:$0xff] }
 0x265   : > { %v3950_v4 = vld [vmem:[#allocation53_spill] sm:$0xff] }
 0x266   : > { %v1017_v59 = vpop.permute.xlu1 %1016  ;;  %v1008_v19 = vmul.f32 %v3948_v7, %v996_v17  ;;  %v1009_v22 = vmul.f32 %v3948_v7, %v997_v11  ;;  %v3953_v11 = vld [vmem:[#allocation54_spill] sm:$0xff] }
 0x269   : > { %v3494_v49 = vpop.eup %2106 }
 0x26a   : > { %v1021_v2 = vpop.permute.xlu1 %1020  ;;  %v3496_v27 = vpop.eup %2108  ;;  %v1618_v12 = vmul.f32 1.0614054, %v3494_v49 }
 0x26b   : > { %v1024_v56 = vsel %vm1022_vm13, %v1017_v59, %v1021_v2  ;;  %v1026_v16 = vsel %vm1022_vm13, %v1021_v2, %v1017_v59  ;;  %v1617_v32 = vmul.f32 1.0614054, %v3496_v27 }
 0x26c   : > { %v1042_v23 = vmul.f32 %v3946_v24, %v1026_v16  ;;  %v1043_v53 = vmul.f32 %v3947_v3, %v1024_v56  ;;  %v1620_v14 = vadd.f32 -1.4531521, %v1618_v12  ;;  %v966_v3 = vadd.f32 %v962_v20, %v920_v60 }
 0x26d   : > { %v1619_v30 = vadd.f32 -1.4531521, %v1617_v32  ;;  %v967_v56 = vadd.f32 %v963_v35, %v921_v10 }
 0x26e   : > { %v1063_v44 = vpop.permute.xlu1 %1062  ;;  %v1055_v12 = vmul.f32 %v1050_v45, %v1043_v53  ;;  %v1012_v20 = vadd.f32 %v1008_v19, %v966_v3  ;;  %v3957_v3 = vld [vmem:[#allocation59_spill] sm:$0xff] }
 0x26f   : > { %v1013_v60 = vadd.f32 %v1009_v22, %v967_v56 }
 0x272   : > { %v1067_v26 = vpop.permute.xlu1 %1066 }
 0x273   : > { %v1070_v59 = vsel %vm1068_vm14, %v1063_v44, %v1067_v26  ;;  %v1072_v2 = vsel %vm1068_vm14, %v1067_v26, %v1063_v44  ;;  %v1234_v44 = vpop.permute.xlu0 %1233  ;;  %v1054_v26 = vmul.f32 %v1050_v45, %v1042_v23 }
 0x274   : > { %v1088_v16 = vmul.f32 %v3949_v61, %v1072_v2  ;;  %v1089_v24 = vmul.f32 %v3950_v4, %v1070_v59  ;;  %v3956_v59 = vld [vmem:[#allocation57_spill] sm:$0xff] }
 0x276   : > { %v1109_v9 = vpop.permute.xlu1 %1108  ;;  %v1100_v53 = vmul.f32 %v1096_v18, %v1088_v16  ;;  %v1101_v45 = vmul.f32 %v1096_v18, %v1089_v24 }
 0x27a   : > { %v1113_v25 = vpop.permute.xlu1 %1112 }
 0x27b   : > { %v1116_v5 = vsel %vm1114_vm15, %v1109_v9, %v1113_v25  ;;  %v1118_v58 = vsel %vm1114_vm15, %v1113_v25, %v1109_v9  ;;  %v3955_v25 = vld [vmem:[#allocation56_spill] sm:$0xff] }
 0x27c   : > { %v1134_v7 = vmul.f32 %v3953_v11, %v1116_v5  ;;  %v1135_v21 = vmul.f32 %v3954_v54, %v1118_v58  ;;  %v1622_v5 = vmul.f32 %v3494_v49, %v1620_v14  ;;  %v1621_v54 = vmul.f32 %v3496_v27, %v1619_v30 }
 0x27d   : > { %v1636_v14 = vmul.f32 %v3483_v62, %v3483_v62 }
 0x27e   : > { %v1155_v37 = vpop.permute.xlu1 %1154  ;;  %v1146_v19 = vmul.f32 %v1142_v51, %v1134_v7  ;;  %v1147_v22 = vmul.f32 %v1142_v51, %v1135_v21  ;;  %v1623_v30 = vadd.f32 1.4214138, %v1621_v54  ;;  %v3959_v7 = vld [vmem:[#allocation60_spill] sm:$0xff] }
 0x282   : > { %v1159_v55 = vpop.permute.xlu1 %1158 }
 0x283   : > { %v1162_v32 = vsel %vm3951_vm2, %v1155_v37, %v1159_v55  ;;  %v1164_v17 = vsel %vm3952_vm3, %v1159_v55, %v1155_v37  ;;  %v1058_v37 = vadd.f32 %v1054_v26, %v1012_v20  ;;  %v1059_v55 = vadd.f32 %v1055_v12, %v1013_v60 }
 0x284   : > { %v1180_v35 = vmul.f32 %v3955_v25, %v1162_v32  ;;  %v1181_v2 = vmul.f32 %v3956_v59, %v1164_v17  ;;  %v3958_v32 = vld [vmem:[#allocation58_spill] sm:$0xff]  ;;  %v1624_v12 = vadd.f32 1.4214138, %v1622_v5 }
 0x285   : > { %v1104_v16 = vadd.f32 %v1100_v53, %v1058_v37  ;;  %v1105_v18 = vadd.f32 %v1101_v45, %v1059_v55  ;;  %v1305_v26 = vmul.f32 %v3958_v32, %v3230_v33  ;;  %v1635_v33 = vmul.f32 %v3486_v15, %v3486_v15  ;;  %v3962_v32 = vld [vmem:[#allocation63_spill] sm:$0xff] }
 0x286   : > { %v1201_v42 = vpop.permute.xlu1 %1200  ;;  %v1192_v4 = vmul.f32 %v1188_v47, %v1180_v35  ;;  %v1193_v24 = vmul.f32 %v1188_v47, %v1181_v2  ;;  %v1626_v53 = vmul.f32 %v3494_v49, %v1624_v12  ;;  %v1638_v45 = vsub.f32 0.0, %v1636_v14 }
 0x287   : > { %v1150_v17 = vadd.f32 %v1146_v19, %v1104_v16  ;;  %v1151_v21 = vadd.f32 %v1147_v22, %v1105_v18  ;;  %v1637_v2 = vsub.f32 0.0, %v1635_v33 }
 0x288   : > { %v1641_v54 = vmul.f32 1.442695, %v1638_v45  ;;  %v1628_v22 = vadd.f32 -0.28449672, %v1626_v53 }
 0x289   : > { %v1196_v60 = vadd.f32 %v1192_v4, %v1150_v17  ;;  %v1197_v62 = vadd.f32 %v1193_v24, %v1151_v21  ;;  %v3961_v4 = vld [vmem:[#allocation62_spill] sm:$0xff] }
 0x28a   : > { %v1205_v9 = vpop.permute.xlu1 %1204  ;;  %v1630_v16 = vmul.f32 %v3494_v49, %v1628_v22  ;;  %2110 = vpow2.f32 %v1641_v54  ;;  %v1371_v24 = vmul.f32 %v3961_v4, %v3330_v48  ;;  %v1404_v48 = vmul.f32 %v3176_v40, %v3370_v43  ;;  %v3967_v54 = vld [vmem:[#allocation66_spill] sm:$0xff]  ;;  %v3970_v22 = vld [vmem:[#allocation13_spill] sm:$0xff]  ;;  %v3973_v4 = vld [vmem:[#allocation35_spill] sm:$0xff] }
 0x28b   : > { %v1208_v10 = vsel %vm1206_vm1, %v1201_v42, %v1205_v9  ;;  %v1210_v23 = vsel %vm1206_vm1, %v1205_v9, %v1201_v42  ;;  %v1280_v42 = vpop.permute.xlu0 %1279  ;;  %v1306_v9 = vmul.f32 %v3959_v7, %v3235_v63  ;;  %v1625_v63 = vmul.f32 %v3496_v27, %v1623_v30 }
 0x28c   : > { %v1226_v58 = vmul.f32 %v3132_v13, %v1208_v10  ;;  %v1227_v56 = vmul.f32 %v3957_v3, %v1210_v23  ;;  %v1338_v3 = vmul.f32 %v3145_v36, %v3348_v28  ;;  %v1632_v30 = vadd.f32 0.2548296, %v1630_v16 }
 0x28d   : > { %vm1647_vm5 = vcmp.lt.f32.partialorder %v3973_v4, 0.0 }
 0x28e   : > { %v1238_v51 = vmul.f32 %v1234_v44, %v1226_v58  ;;  %v1239_v13 = vmul.f32 %v1234_v44, %v1227_v56  ;;  %v1639_v58 = vmul.f32 1.442695, %v1637_v2  ;;  %v3960_v56 = vld [vmem:[#allocation61_spill] sm:$0xff]  ;;  %v1634_v7 = vmul.f32 %v3494_v49, %v1632_v30  ;;  %v3975_v30 = vld [vmem:[#allocation31_spill] sm:$0xff] }
 0x28f   : > { %v1247_v61 = vpop.permute.xlu1 %1246  ;;  %v1313_v44 = vpop.permute.xlu0 %1312 }
 0x290   : > { %v1242_v25 = vadd.f32 %v1238_v51, %v1196_v60  ;;  %v1243_v35 = vadd.f32 %v1239_v13, %v1197_v62  ;;  %v1317_v37 = vmul.f32 %v1313_v44, %v1305_v26  ;;  %v1318_v55 = vmul.f32 %v1313_v44, %v1306_v9 }
 0x291   : > { %2112 = vpow2.f32 %v1639_v58  ;;  %v1372_v26 = vmul.f32 %v3962_v32, %v3336_v0  ;;  %v1405_v0 = vmul.f32 %v3179_v38, %v3375_v34  ;;  %v1470_v38 = vmul.f32 %v3194_v52, %v3404_v8  ;;  %v3969_v52 = vld [vmem:[#allocation37_spill] sm:$0xff] }
 0x293   : > { %v1251_v11 = vpop.permute.xlu1 %1250  ;;  %v1346_v18 = vpop.permute.xlu0 %1345 }
 0x294   : > { %v1254_v20 = vsel %vm1252_vm0, %v1247_v61, %v1251_v11  ;;  %v1256_v47 = vsel %vm1252_vm0, %v1251_v11, %v1247_v61  ;;  %v1339_v61 = vmul.f32 %v3960_v56, %v3353_v39  ;;  %v1350_v12 = vmul.f32 %v1346_v18, %v1338_v3  ;;  %v2111_v33 = vpop.eup %2110 }
 0x295   : > { %v1272_v10 = vmul.f32 %v3166_v41, %v1254_v20  ;;  %v1273_v23 = vmul.f32 %v3169_v29, %v1256_v47  ;;  %v1627_v29 = vadd.f32 -0.28449672, %v1625_v63  ;;  %v1437_v20 = vmul.f32 %v3182_v31, %v3388_v50  ;;  %v3963_v31 = vld [vmem:[#allocation64_spill] sm:$0xff] }
 0x296   : > { %v1351_v14 = vmul.f32 %v1346_v18, %v1339_v61  ;;  %v1438_v47 = vmul.f32 %v3185_v1, %v3393_v57  ;;  %v1644_v44 = vmul.f32 %v2111_v33, %v1634_v7  ;;  %v1471_v34 = vmul.f32 %v3963_v31, %v3409_v6  ;;  %v3971_v6 = vld [vmem:[#allocation30_spill] sm:$0xff] }
 0x297   : > { %v1284_v59 = vmul.f32 %v1280_v42, %v1272_v10  ;;  %v1285_v46 = vmul.f32 %v1280_v42, %v1273_v23  ;;  %v1629_v42 = vmul.f32 %v3496_v27, %v1627_v29  ;;  %v1445_v60 = vpop.permute.xlu0 %1444  ;;  %v1537_v29 = vmul.f32 %v3971_v6, %v3970_v22  ;;  %v3972_v18 = vld [vmem:[#allocation18_spill] sm:$0xff] }
 0x298   : > { %v1449_v53 = vmul.f32 %v1445_v60, %v1437_v20  ;;  %v1450_v45 = vmul.f32 %v1445_v60, %v1438_v47  ;;  %vm1648_vm4 = vcmp.lt.f32.partialorder %v3972_v18, 0.0  ;;  %v3978_v60 = vld [vmem:[#allocation15_spill] sm:$0xff] }
 0x299   : > { %v1288_v15 = vadd.f32 %v1284_v59, %v1242_v25  ;;  %v1289_v5 = vadd.f32 %v1285_v46, %v1243_v35  ;;  %v1631_v36 = vadd.f32 0.2548296, %v1629_v42  ;;  %v1646_v35 = vsub.f32 1.0, %v1644_v44 }
 0x29b   : > { %v1321_v19 = vadd.f32 %v1317_v37, %v1288_v15  ;;  %v1322_v41 = vadd.f32 %v1318_v55, %v1289_v5  ;;  %v1633_v9 = vmul.f32 %v3496_v27, %v1631_v36  ;;  %v2113_v10 = vpop.eup %2112  ;;  %v3964_v37 = vld [vmem:[#allocation39_spill] sm:$0xff]  ;;  %v3965_v55 = vld [vmem:[#allocation65_spill] sm:$0xff]  ;;  %v3966_v5 = vld [vmem:[#allocation16_spill] sm:$0xff]  ;;  %v1544_v58 = vpop.permute.xlu0 %1543  ;;  %v1650_v56 = vsub.f32 0.0, %v1646_v35 }
 0x29c   : > { %v1503_v15 = vmul.f32 %v3965_v55, %v3964_v37  ;;  %v1549_v32 = vmul.f32 %v1544_v58, %v1537_v29 }
 0x29d   : > { %v1354_v17 = vadd.f32 %v1350_v12, %v1321_v19  ;;  %v1355_v39 = vadd.f32 %v1351_v14, %v1322_v41  ;;  %v1643_v27 = vmul.f32 %v2113_v10, %v1633_v9  ;;  %v1504_v19 = vmul.f32 %v3967_v54, %v3966_v5  ;;  %v3968_v41 = vld [vmem:[#allocation12_spill] sm:$0xff]  ;;  %v3974_v14 = vld [vmem:[#allocation21_spill] sm:$0xff] }
 0x29e   : > { %v1536_v8 = vmul.f32 %v3969_v52, %v3968_v41  ;;  %v1569_v36 = vmul.f32 %v3975_v30, %v3974_v14  ;;  %v3979_v10 = vld [vmem:[#allocation17_spill] sm:$0xff] }
 0x29f   : > { %v1645_v59 = vsub.f32 1.0, %v1643_v27 }
 0x2a1   : > { %v1649_v61 = vsub.f32 0.0, %v1645_v59 }
 0x2a4   : > { %v1379_v28 = vpop.permute.xlu1 %1378 }
 0x2a5   : > { %v1383_v21 = vmul.f32 %v1379_v28, %v1371_v24  ;;  %v1384_v51 = vmul.f32 %v1379_v28, %v1372_v26  ;;  %v1548_v24 = vmul.f32 %v1544_v58, %v1536_v8  ;;  %v3976_v28 = vld [vmem:[#allocation14_spill] sm:$0xff] }
 0x2a7   : > { %v1387_v13 = vadd.f32 %v1383_v21, %v1354_v17  ;;  %v1388_v11 = vadd.f32 %v1384_v51, %v1355_v39  ;;  %v3977_v17 = vld [vmem:[#allocation19_spill] sm:$0xff]  ;;  %v1652_v21 = vsel %vm1648_vm4, %v1650_v56, %v1646_v35  ;;  %v1651_v51 = vsel %vm1647_vm5, %v1649_v61, %v1645_v59 }
 0x2a8   : > { %v1570_v39 = vmul.f32 %v3977_v17, %v3976_v28  ;;  %v1653_v20 = vadd.f32 1.0, %v1651_v51 }
 0x2a9   : > { %v1412_v62 = vpop.permute.xlu1 %1411 }
 0x2aa   : > { %v1416_v23 = vmul.f32 %v1412_v62, %v1404_v48  ;;  %v1417_v49 = vmul.f32 %v1412_v62, %v1405_v0  ;;  %v1654_v0 = vadd.f32 1.0, %v1652_v21  ;;  %v1604_v62 = vmul.f32 0.5, %v3978_v60 }
 0x2ac   : > { %v1420_v40 = vadd.f32 %v1416_v23, %v1387_v13  ;;  %v1421_v43 = vadd.f32 %v1417_v49, %v1388_v11  ;;  %v1603_v23 = vmul.f32 0.5, %v3979_v10 }
 0x2ae   : > { %v1453_v50 = vadd.f32 %v1449_v53, %v1420_v40  ;;  %v1454_v1 = vadd.f32 %v1450_v45, %v1421_v43  ;;  %v1478_v57 = vpop.permute.xlu1 %1477  ;;  %v1656_v53 = vmul.f32 %v1654_v0, %v1604_v62  ;;  %v1655_v45 = vmul.f32 %v1653_v20, %v1603_v23 }
 0x2af   : > { %v1482_v63 = vmul.f32 %v1478_v57, %v1470_v38  ;;  %v1483_v25 = vmul.f32 %v1478_v57, %v1471_v34 }
 0x2b1   : > { %v1486_v46 = vadd.f32 %v1482_v63, %v1453_v50  ;;  %v1487_v2 = vadd.f32 %v1483_v25, %v1454_v1  ;;  %v1725_v50 = vld [vmem:[%s3696_s8] sm:$0x1] }
 0x2b2   : > { %v1661_v1 = vld [vmem:[%s3694_s6] sm:$0x3] }
 0x2b3   : > { %v1511_v3 = vpop.permute.xlu1 %1510 }
 0x2b4   : > { %v1515_v16 = vmul.f32 %v1511_v3, %v1503_v15  ;;  %v1516_v42 = vmul.f32 %v1511_v3, %v1504_v19 }
 0x2b6   : > { %v1519_v26 = vadd.f32 %v1515_v16, %v1486_v46  ;;  %v1520_v12 = vadd.f32 %v1516_v42, %v1487_v2 }
 0x2b8   : > { %v1577_v13 = vpop.permute.xlu1 %1576  ;;  %v1552_v11 = vadd.f32 %v1548_v24, %v1519_v26  ;;  %v1553_v7 = vadd.f32 %v1549_v32, %v1520_v12 }
 0x2b9   : > { %v1581_v9 = vmul.f32 %v1577_v13, %v1569_v36  ;;  %v1582_v48 = vmul.f32 %v1577_v13, %v1570_v39 }
 0x2bb   : > { %v1585_v47 = vadd.f32 %v1581_v9, %v1552_v11  ;;  %v1586_v33 = vadd.f32 %v1582_v48, %v1553_v7 }
 0x2bd   : > { %v1597_v49 = vpop.permute.xlu1 %1596 }
 0x2be   : > { %v1601_v44 = vadd.f32 %v1597_v49, %v1585_v47  ;;  %v1602_v27 = vadd.f32 %v1597_v49, %v1586_v33 }
 0x2c0   : > { %v1658_v40 = vmul.f32 %v1656_v53, %v1602_v27  ;;  %v1657_v43 = vmul.f32 %v1655_v45, %v1601_v44 }
 0x2c1   : > { %v1730_v63 = vpop.permute.xlu1 %1729 }
 0x2c2   : > { %v1660_v38 = vpack.c.bf16 %v1658_v40, %v1658_v40  ;;  %v1659_v31 = vpack.c.bf16 %v1657_v43, %v1657_v43 }
 0x2c4   : > { %1938 = vmatprep.subr.msk.bf16.mxu1 %vm1672_vm6, %v1660_v38  ;;  %1940 = vmatprep.subr.msk.bf16.mxu0 %vm1672_vm6, %v1660_v38  ;;  %v1674_v34 = vsel %vm1672_vm6, %v1659_v31, 0  ;;  %v1666_v57 = vpop.permute.xlu0 %1665 }
 0x2c5   : > { %1680 = vmatpush1.bf16.msra.mxu1 %v1674_v34  ;;  %1736 = vmatpush1.bf16.msra.mxu0 %v1674_v34 }
 0x2c8   : > { %1941 = vmatmul.mubr.msk.bf16.vlgmr.msra.gmra.mrb[4].mxu0 %vm1668_vm7, %v1725_v50  ;;  %1939 = vmatmul.mubr.msk.bf16.vlgmr.msra.gmra.mrb[0].mxu1 %vm1668_vm7, %v1661_v1 }
 0x39b   : > { %v1769_v25 = vpop.f32.mrb[4].mxu0  ;;  %v1713_v35 = vpop.f32.mrb[0].mxu1 }
 0x39c   : > { %v1770_v59 = vadd.f32 %v1769_v25, %v1730_v63  ;;  %v1771_v46 = vpop.f32.mrb[5].mxu0  ;;  %v1715_v2 = vpop.f32.mrb[1].mxu1  ;;  %v1714_v37 = vadd.f32 %v1713_v35, %v1666_v57 }
 0x39d   : > { %v1772_v55 = vadd.f32 %v1771_v46, %v1730_v63  ;;  %v1717_v15 = vpop.f32.mrb[2].mxu1  ;;  %v1773_v5 = vpop.f32.mrb[6].mxu0  ;;  %v1716_v54 = vadd.f32 %v1715_v2, %v1666_v57 }
 0x39e   : > { %v1718_v19 = vpop.f32.mrb[3].mxu1  ;;  %v1774_v41 = vpop.f32.mrb[7].mxu0 }
 0x39f   : > { %v1778_v52 = vcombine.low %v1770_v59, %v1772_v55  ;;  %v1722_v8 = vcombine.low %v1714_v37, %v1716_v54 }
 0x3a1   : > { %1724 = vst [vmem:[%s398_s13] sm:$0xff] %v1722_v8  ;;  %1942 = vst.sshfl [vmem:[%s405_s30] sm:$0x33 pattern:$0x76325410] %v1778_v52 }
 0x3a2   : > { %2156 = shalt.err (!%p2153_p7)
}
 0x3a3   : > { %s2157_s1 = scalar_lea.hbm %s3616_s15, 128  ;;  %s2161_s30 = scalar_lea.hbm %s3698_s10, 256 }
 0x3a4   : > { %p2158_p8 = scmp.ne.s32.totalorder %s3616_s15, %s2157_s1  ;;  %p2162_p1 = scmp.lt.u32.totalorder %s3616_s15, %s3698_s10 }
 0x3a5   : > { %p2163_p0 = scmp.lt.u32.totalorder %s2161_s30, %s2157_s1  ;;  %p2165_p6 = scmp.lt.u32.totalorder %s2157_s1, %s3616_s15 }
 0x3a6   : > { %p2159_p11 = pnand %p2158_p8, %p3980_p9 }
 0x3a7   : > { %p2164_p5 = por %p2163_p0, %p2162_p1 }
 0x3a8   : > { %p2160_p13 = pneg %p2159_p11 }
 0x3a9   : > { %p2166_p10 = por %p2165_p6, %p2164_p5 }
 0x3ab   : > { %p2167_p12 = pnand %p2166_p10, %p2160_p13 }
 0x3ad   : > { %2170 = shalt.err (!%p2167_p12)
}
 0x3ae   : > { %1958 = dma.vmem_to_hbm [thread:$0]  (%p3980_p9), %s3618_s16, 128, %s3616_s15, %s1789_s12  }
 0x3af   : > { %s1794_s2 = scalar_lea.sflag [#allocation7], %s3607_s24  ;;  %s2171_s0 = scalar_lea.vmem %s3625_s22, 64 }
 0x3b0   : > { %p2172_p2 = scmp.ne.s32.totalorder %s3625_s22, %s2171_s0  ;;  %s2291_s14 = smov [#allocation6]  }
 0x3b1   : > { %s2175_s1 = sshll.u32 %s2291_s14, 4  ;;  %s2176_s1 = int_to_ptr.vmem [resolvable:$false] %s2175_s1 }
 0x3b2   : > { %p2173_p3 = pnand %p2172_p2, %p3980_p9  ;;  %s2177_s13 = scalar_lea.vmem %s2176_s1, 128 }
 0x3b3   : > { %p2178_p7 = scmp.lt.s32.totalorder %s3625_s22, %s2176_s1  ;;  %p2179_p8 = scmp.lt.s32.totalorder %s2177_s13, %s2171_s0 }
 0x3b4   : > { %p2174_p4 = pneg %p2173_p3 }
 0x3b5   : > { %p2180_p11 = por %p2179_p8, %p2178_p7 }
 0x3b7   : > { %p2181_p13 = pnand %p2180_p11, %p2174_p4 }
 0x3b9   : > { %2184 = shalt.err (!%p2181_p13)
}
 0x3ba   : > { %s2185_s24 = scalar_lea.hbm %s3623_s21, 64  ;;  %s2189_s12 = scalar_lea.hbm %s3699_s11, 128 }
 0x3bb   : > { %p2186_p1 = scmp.ne.s32.totalorder %s3623_s21, %s2185_s24  ;;  %p2190_p6 = scmp.lt.u32.totalorder %s3623_s21, %s3699_s11 }
 0x3bc   : > { %p2191_p10 = scmp.lt.u32.totalorder %s2189_s12, %s2185_s24  ;;  %p2193_p2 = scmp.lt.u32.totalorder %s2185_s24, %s3623_s21 }
 0x3bd   : > { %p2187_p0 = pnand %p2186_p1, %p3980_p9 }
 0x3be   : > { %p2192_p12 = por %p2191_p10, %p2190_p6 }
 0x3bf   : > { %p2188_p5 = pneg %p2187_p0 }
 0x3c0   : > { %p2194_p3 = por %p2193_p2, %p2192_p12 }
 0x3c2   : > { %p2195_p4 = pnand %p2194_p3, %p2188_p5 }
 0x3c4   : > { %2198 = shalt.err (!%p2195_p4)
}
 0x3c5   : > { %1959 = dma.vmem_to_hbm [thread:$0]  (%p3980_p9), %s3625_s22, 64, %s3623_s21, %s1794_s2  }
 0x3c6 PF: > { %p1975_p7 = scmp.ge.s32.totalorder %s2241_s20, 2  ;;  %s1834_s26 = sand.u32 1, %s2229_s17  }
 0x3c7   : > { %p3981_p8 = scmp.ne.s32.totalorder %s3811_s28, 0  ;;  %s1835_s29 = scalar_lea.sflag [#allocation4], %s1834_s26 }
 0x3c9   : > { %p1967_p11 = pnand %p1975_p7, %p3981_p8 }
 0x3cb   : > { %2220 = dma.done.wait (!%p1967_p11), %s1835_s29, 128  }
 0x3cc   : > { %2222 = vsyncadd (!%p1967_p11), %s1835_s29, 4294967168  ;;  %s1844_s0 = scalar_lea.sflag [#allocation7], %s1834_s26 }
 0x3cd   : > { %2224 = dma.done.wait (!%p1967_p11), %s1844_s0, 64  }
 0x3ce   : > { %2226 = vsyncadd (!%p1967_p11), %s1844_s0, 4294967232  ;;  %s3982_s27 = sld [smem:[#allocation11_spill]]  ;;  %p26_p9 = scmp.ge.s32.totalorder %s2377_s23, 4  }
 0x3cf   : > { %s3983_s17 = smov %s2233_s18  ;;  %s3984_s18 = smov %s2237_s19 }
 0x3d0   : > { %s3986_s20 = smov %s2377_s23  ;;  %28 = sbr.rel (!%p26_p9) target bundleno = 10 (0xa), region = 142 }
 0x3d4   : > { %s3985_s19 = smov %s3982_s27 }
 0x3d7   :  { %1849 = vsyncpa [#allocation3], 1 }
 0x3d8   :  { %1851 = vsyncpa [#allocation3 + $0x1], 1 }
 0x3d9   :  { %1852 = vsyncpa [#allocation4], 1 }
 0x3da   :  { %1854 = vsyncpa [#allocation4 + $0x1], 1 }
 0x3db   :  { %1855 = vsyncpa [#allocation7], 1 }
 0x3dc   :  { %1857 = vsyncpa [#allocation7 + $0x1], 1 }

</bundles_post_ra>
